<compile_context>
chip_gen: v6e
topology: v6e:2x2x1
jax: 0.10.0
libtpu: 0.0.40
codegen_flags: <defaults>
</compile_context>

<pallas_src>
import functools

import jax
import jax.numpy as jnp
from jax.experimental import pallas as pl
from jax.experimental.pallas import tpu as pltpu


def _round_up(x, m):
    return ((x + m - 1) // m) * m


def dueling_dqn_kernel(
    x_ref,
    w1_ref, b1_ref,     # shared:            Linear(F, 1024)
    w2_ref, b2_ref,     # shared:            Linear(1024, 128)
    wh1_ref, bh1_ref,   # fused head layer1: Linear(128, 512+128)
    wh2_ref, bh2_ref,   # fused head layer2: block-diag Linear(640, 128-pad)
    out_ref,
    *, n_actions,
):
    x = x_ref[...]

    # shared trunk
    h = jnp.dot(x.astype(jnp.bfloat16), w1_ref[...],
                preferred_element_type=jnp.float32) + b1_ref[...]
    h = jnp.maximum(h, 0.0)
    h = jnp.dot(h.astype(jnp.bfloat16), w2_ref[...],
                preferred_element_type=jnp.float32) + b2_ref[...]
    # (no ReLU here: matches nn.Sequential(Linear, ReLU, Linear) in the spec)

    # fused advantage/value first layers:
    #   columns [0:512]   -> advantage hidden
    #   columns [512:640] -> value hidden
    g = jnp.dot(h.astype(jnp.bfloat16), wh1_ref[...],
                preferred_element_type=jnp.float32) + bh1_ref[...]
    g = jnp.maximum(g, 0.0)

    # fused block-diagonal second layers, zero-padded to a 128-lane width:
    #   columns [0:A] -> advantage, column [A] -> value, columns [A+1:] -> 0
    av = jnp.dot(g.astype(jnp.bfloat16), wh2_ref[...],
                 preferred_element_type=jnp.float32) + bh2_ref[...]

    # dueling combine on full-width vregs (lane-dense, no narrow slices):
    #   out = value + advantage - advantage.mean(dim=1, keepdim=True)
    col = jax.lax.broadcasted_iota(jnp.int32, av.shape, 1)
    adv_sum = jnp.sum(jnp.where(col < n_actions, av, 0.0),
                      axis=-1, keepdims=True)
    adv_mean = adv_sum * (1.0 / float(n_actions))
    val = jnp.sum(jnp.where(col == n_actions, av, 0.0),
                  axis=-1, keepdims=True)
    # columns >= A hold don't-care values; the wrapper slices [:, :A].
    out_ref[...] = val + av - adv_mean


def _tile_and_vmem(batch):
    """Per-generation batch-tile cap, scoped-VMEM limit (bytes), 2-step hint."""
    kind = ""
    try:
        kind = jax.devices()[0].device_kind.lower()
    except Exception:
        pass
    if "v5 lite" in kind or "v5e" in kind or "v5litepod" in kind:
        # 128 MiB physical VMEM but 16 MiB default scoped; raise the limit so
        # tm=1024 (~12 MiB of f32 intermediates + x/out buffers) fits.
        return 1024, 64 * 1024 * 1024, False
    if "v7" in kind:
        # 64 MiB physical / 32 MiB default scoped; keep tile <= 2048 and make
        # sure there are >= 2 grid steps so both TensorCores get work.
        return 2048, 48 * 1024 * 1024, True
    if "v6" in kind:
        # 128 MiB physical / 32 MiB default scoped.
        return 2048, 100 * 1024 * 1024, False
    # Unknown device: conservative tile, leave the scoped-VMEM default alone.
    return 1024, None, False


def dueling_dqn_forward(x, ops, *, batch_tile=None, single_buffer_weights=True):
    batch, in_features = x.shape
    n_actions = int(ops["n_actions"])
    n_pad = ops["wh2"].shape[1]   # lane-dense padded head width (>= A+1)
    h1 = ops["w1"].shape[1]       # 1024
    h2 = ops["w2"].shape[1]       # 128
    hh = ops["wh1"].shape[1]      # 640

    cap, vmem_limit, want_two_steps = _tile_and_vmem(batch)
    if batch_tile is not None:
        tm = int(batch_tile)
    else:
        tm = cap
        if want_two_steps:
            # At least 2 grid steps so dimension_semantics=("parallel",) can
            # shard the batch axis across both v7x TensorCores.
            tm = min(tm, _round_up(pl.cdiv(batch, 2), 8))
    tm = max(8, min(tm, _round_up(batch, 8)))
    grid = (pl.cdiv(batch, tm),)

    operands = (
        x,
        ops["w1"], ops["b1"],
        ops["w2"], ops["b2"],
        ops["wh1"], ops["bh1"],
        ops["wh2"], ops["bh2"],
    )

    flops = 2 * batch * (in_features * h1 + h1 * h2 + h2 * hh + hh * n_pad)
    bytes_accessed = (
        sum(int(a.size) * a.dtype.itemsize for a in operands[1:])
        + batch * (in_features + n_pad) * 4)

    cp_kwargs = dict(dimension_semantics=("parallel",))
    if vmem_limit is not None:
        cp_kwargs["vmem_limit_bytes"] = int(vmem_limit)

    def build(single_buffer):
        def resident(arr):
            # Full-array block + constant block index => stays resident in
            # VMEM across grid steps (Pallas skips the re-DMA).  Single-buffer
            # it so the redundant second pipeline buffer isn't allocated.
            if single_buffer:
                return pl.BlockSpec(arr.shape, lambda i: (0, 0),
                                    pipeline_mode=pl.Buffered(1))
            return pl.BlockSpec(arr.shape, lambda i: (0, 0))

        in_specs = [pl.BlockSpec((tm, in_features), lambda i: (i, 0))]
        in_specs += [resident(a) for a in operands[1:]]
        out_specs = pl.BlockSpec((tm, n_pad), lambda i: (i, 0))

        return pl.pallas_call(
            functools.partial(dueling_dqn_kernel, n_actions=n_actions),
            out_shape=jax.ShapeDtypeStruct((batch, n_pad), jnp.float32),
            grid=grid,
            in_specs=in_specs,
            out_specs=out_specs,
            compiler_params=pltpu.CompilerParams(**cp_kwargs),
            cost_estimate=pl.CostEstimate(
                flops=flops, transcendentals=0,
                bytes_accessed=bytes_accessed),
        )(*operands)

    if single_buffer_weights:
        try:
            out_padded = build(True)
        except Exception:
            # TODO(synk): this jax build rejected pipeline_mode=pl.Buffered(1);
            # falling back to default double-buffered resident weights.
            out_padded = build(False)
    else:
        out_padded = build(False)

    return out_padded[:, :n_actions]


def init_params(key, input_size, n_actions):
    """Deterministic, PyTorch-Linear-like init (uniform +- 1/sqrt(fan_in)).

    Weights are stored (in_features, out_features) so each Linear is x @ W + b
    (PyTorch stores (out, in) and does x @ W.T; same math).
    """
    def linear(key, fan_in, fan_out):
        kw, kb = jax.random.split(key)
        bound = 1.0 / jnp.sqrt(float(fan_in))
        w = jax.random.uniform(kw, (fan_in, fan_out), jnp.float32, -bound, bound)
        b = jax.random.uniform(kb, (1, fan_out), jnp.float32, -bound, bound)
        return w, b

    keys = jax.random.split(key, 6)
    w1, b1 = linear(keys[0], input_size, 1024)
    w2, b2 = linear(keys[1], 1024, 128)
    wa1, ba1 = linear(keys[2], 128, 512)
    wa2, ba2 = linear(keys[3], 512, n_actions)
    wv1, bv1 = linear(keys[4], 128, 128)
    wv2, bv2 = linear(keys[5], 128, 1)
    return dict(
        w1=w1, b1=b1, w2=w2, b2=b2,
        wa1=wa1, ba1=ba1, wa2=wa2, ba2=ba2,
        wv1=wv1, bv1=bv1, wv2=wv2, bv2=bv2,
    )


def prepare_operands(params, weight_dtype=jnp.bfloat16, lane_pad=128):
    """Fuse the two head branches, pad head-2 lane-dense, cast weights.

      wh1 = concat([wa1, wv1], axis=1)                   -> (128, 640)
      wh2 = block-diag(wa2 -> cols [0:A], wv2 -> col A),
            zero-padded to a multiple of 128 columns     -> (640, 128)

    Biases stay in f32 (added to the f32 accumulator inside the kernel).
    """
    wa2, wv2 = params["wa2"], params["wv2"]
    k_a, n_actions = wa2.shape     # (512, A)
    k_v = wv2.shape[0]             # 128
    n_pad = max(lane_pad, _round_up(n_actions + 1, lane_pad))

    wh1 = jnp.concatenate([params["wa1"], params["wv1"]], axis=1)
    bh1 = jnp.concatenate([params["ba1"], params["bv1"]], axis=1)

    wh2 = jnp.zeros((k_a + k_v, n_pad), jnp.float32)
    wh2 = wh2.at[:k_a, :n_actions].set(wa2)
    wh2 = wh2.at[k_a:, n_actions:n_actions + 1].set(wv2)
    bh2 = jnp.zeros((1, n_pad), jnp.float32)
    bh2 = bh2.at[:, :n_actions].set(params["ba2"])
    bh2 = bh2.at[:, n_actions:n_actions + 1].set(params["bv2"])

    return dict(
        w1=params["w1"].astype(weight_dtype), b1=params["b1"],
        w2=params["w2"].astype(weight_dtype), b2=params["b2"],
        wh1=wh1.astype(weight_dtype), bh1=bh1,
        wh2=wh2.astype(weight_dtype), bh2=bh2,
        n_actions=int(n_actions),
    )


def reference_forward(x, p):
    """Original full-f32 semantics of the PyTorch DuelingDQN forward."""
    h = jnp.maximum(x @ p["w1"] + p["b1"], 0.0)
    h = h @ p["w2"] + p["b2"]
    a = jnp.maximum(h @ p["wa1"] + p["ba1"], 0.0)
    adv = a @ p["wa2"] + p["ba2"]
    v = jnp.maximum(h @ p["wv1"] + p["bv1"], 0.0)
    val = v @ p["wv2"] + p["bv2"]
    return val + adv - jnp.mean(adv, axis=1, keepdims=True)


def reference_forward_fused(x, ops):
    """Same fused / bf16-weight / padded numerics as the kernel, in plain XLA."""
    bf = jnp.bfloat16
    n_actions = int(ops["n_actions"])
    h = jnp.dot(x.astype(bf), ops["w1"],
                preferred_element_type=jnp.float32) + ops["b1"]
    h = jnp.maximum(h, 0.0)
    h = jnp.dot(h.astype(bf), ops["w2"],
                preferred_element_type=jnp.float32) + ops["b2"]
    g = jnp.dot(h.astype(bf), ops["wh1"],
                preferred_element_type=jnp.float32) + ops["bh1"]
    g = jnp.maximum(g, 0.0)
    av = jnp.dot(g.astype(bf), ops["wh2"],
                 preferred_element_type=jnp.float32) + ops["bh2"]
    adv = av[:, :n_actions]
    val = av[:, n_actions:n_actions + 1]
    return val + adv - jnp.mean(adv, axis=1, keepdims=True)


if __name__ == "__main__":
    key = jax.random.PRNGKey(0)
    k_x, k_p = jax.random.split(key)

    batch, input_size, n_actions = 2, 16, 6
    x = jax.random.normal(k_x, (batch, input_size), dtype=jnp.float32)
    params = init_params(k_p, input_size, n_actions)
    ops = prepare_operands(params)

    out = dueling_dqn_forward(x, ops)
    out = jax.block_until_ready(out)
    assert out.shape == (batch, n_actions)

    # Tight check against a reference with identical fused / bf16 numerics.
    ref_bf16 = reference_forward_fused(x, ops)
    assert jnp.allclose(out, ref_bf16, atol=2e-3, rtol=2e-3), (
        float(jnp.max(jnp.abs(out - ref_bf16))))
    # Looser check against the original full-f32 semantics (bf16 weights).
    # TODO(synk): keep f32 weights instead of bf16 if bit-parity with the
    # PyTorch module is required (e.g. training-target generation).
    ref_f32 = reference_forward(x, params)
    assert jnp.allclose(out, ref_f32, atol=5e-2, rtol=5e-2), (
        float(jnp.max(jnp.abs(out - ref_f32))))

    print("KERNEL_OK")
</pallas_src>

<mosaic_0001>
module attributes {stable_mosaic.version = 11 : i64} {
  func.func @dueling_dqn_kernel(%arg0: i32, %arg1: memref<8x16xf32, #tpu.memory_space<vmem>>, %arg2: memref<16x1024xbf16, #tpu.memory_space<vmem>>, %arg3: memref<1x1024xf32, #tpu.memory_space<vmem>>, %arg4: memref<1024x128xbf16, #tpu.memory_space<vmem>>, %arg5: memref<1x128xf32, #tpu.memory_space<vmem>>, %arg6: memref<128x640xbf16, #tpu.memory_space<vmem>>, %arg7: memref<1x640xf32, #tpu.memory_space<vmem>>, %arg8: memref<640x128xbf16, #tpu.memory_space<vmem>>, %arg9: memref<1x128xf32, #tpu.memory_space<vmem>>, %arg10: memref<8x128xf32, #tpu.memory_space<vmem>>) attributes {dimension_semantics = [#tpu.dimension_semantics<parallel>], iteration_bounds = array<i64: 1>, scalar_prefetch = 0 : i64, scratch_operands = 0 : i64, tpu.core_type = #tpu.core_type<tc>, window_params = [{transform_indices = @transform_0, window_bounds = array<i64: 8, 16>}, {pipeline_mode = #tpu.pipeline_mode<synchronous>, transform_indices = @transform_1, window_bounds = array<i64: 16, 1024>}, {pipeline_mode = #tpu.pipeline_mode<synchronous>, transform_indices = @transform_2, window_bounds = array<i64: 1, 1024>}, {pipeline_mode = #tpu.pipeline_mode<synchronous>, transform_indices = @transform_3, window_bounds = array<i64: 1024, 128>}, {pipeline_mode = #tpu.pipeline_mode<synchronous>, transform_indices = @transform_4, window_bounds = array<i64: 1, 128>}, {pipeline_mode = #tpu.pipeline_mode<synchronous>, transform_indices = @transform_5, window_bounds = array<i64: 128, 640>}, {pipeline_mode = #tpu.pipeline_mode<synchronous>, transform_indices = @transform_6, window_bounds = array<i64: 1, 640>}, {pipeline_mode = #tpu.pipeline_mode<synchronous>, transform_indices = @transform_7, window_bounds = array<i64: 640, 128>}, {pipeline_mode = #tpu.pipeline_mode<synchronous>, transform_indices = @transform_8, window_bounds = array<i64: 1, 128>}, {transform_indices = @transform_9, window_bounds = array<i64: 8, 128>}]} {
    %c0 = arith.constant 0 : index
    %c0_0 = arith.constant 0 : index
    %0 = vector.load %arg1[%c0, %c0_0] : memref<8x16xf32, #tpu.memory_space<vmem>>, vector<8x16xf32>
    %1 = arith.truncf %0 : vector<8x16xf32> to vector<8x16xbf16>
    %c0_1 = arith.constant 0 : index
    %c0_2 = arith.constant 0 : index
    %2 = vector.load %arg2[%c0_1, %c0_2] : memref<16x1024xbf16, #tpu.memory_space<vmem>>, vector<16x1024xbf16>
    %cst = arith.constant dense<0.000000e+00> : vector<8x1024xf32>
    %3 = tpu.matmul %1, %2, %cst {dimension_numbers = #tpu.dot_dimension_numbers<[1], [0], [0], [1], [0, 0, 1, 1], [], []>} : vector<8x16xbf16>, vector<16x1024xbf16>, vector<8x1024xf32> -> vector<8x1024xf32>
    %c0_3 = arith.constant 0 : index
    %c0_4 = arith.constant 0 : index
    %4 = vector.load %arg3[%c0_3, %c0_4] : memref<1x1024xf32, #tpu.memory_space<vmem>>, vector<1x1024xf32>
    %5 = vector.broadcast %4 : vector<1x1024xf32> to vector<8x1024xf32>
    %6 = arith.addf %3, %5 : vector<8x1024xf32>
    %cst_5 = arith.constant 0.000000e+00 : f32
    %7 = vector.broadcast %cst_5 : f32 to vector<8x1024xf32>
    %8 = arith.maximumf %6, %7 : vector<8x1024xf32>
    %9 = arith.truncf %8 : vector<8x1024xf32> to vector<8x1024xbf16>
    %c0_6 = arith.constant 0 : index
    %c0_7 = arith.constant 0 : index
    %10 = vector.load %arg4[%c0_6, %c0_7] : memref<1024x128xbf16, #tpu.memory_space<vmem>>, vector<1024x128xbf16>
    %cst_8 = arith.constant dense<0.000000e+00> : vector<8x128xf32>
    %11 = tpu.matmul %9, %10, %cst_8 {dimension_numbers = #tpu.dot_dimension_numbers<[1], [0], [0], [1], [0, 0, 1, 1], [], []>} : vector<8x1024xbf16>, vector<1024x128xbf16>, vector<8x128xf32> -> vector<8x128xf32>
    %c0_9 = arith.constant 0 : index
    %c0_10 = arith.constant 0 : index
    %12 = vector.load %arg5[%c0_9, %c0_10] : memref<1x128xf32, #tpu.memory_space<vmem>>, vector<1x128xf32>
    %13 = vector.broadcast %12 : vector<1x128xf32> to vector<8x128xf32>
    %14 = arith.addf %11, %13 : vector<8x128xf32>
    %15 = arith.truncf %14 : vector<8x128xf32> to vector<8x128xbf16>
    %c0_11 = arith.constant 0 : index
    %c0_12 = arith.constant 0 : index
    %16 = vector.load %arg6[%c0_11, %c0_12] : memref<128x640xbf16, #tpu.memory_space<vmem>>, vector<128x640xbf16>
    %cst_13 = arith.constant dense<0.000000e+00> : vector<8x640xf32>
    %17 = tpu.matmul %15, %16, %cst_13 {dimension_numbers = #tpu.dot_dimension_numbers<[1], [0], [0], [1], [0, 0, 1, 1], [], []>} : vector<8x128xbf16>, vector<128x640xbf16>, vector<8x640xf32> -> vector<8x640xf32>
    %c0_14 = arith.constant 0 : index
    %c0_15 = arith.constant 0 : index
    %18 = vector.load %arg7[%c0_14, %c0_15] : memref<1x640xf32, #tpu.memory_space<vmem>>, vector<1x640xf32>
    %19 = vector.broadcast %18 : vector<1x640xf32> to vector<8x640xf32>
    %20 = arith.addf %17, %19 : vector<8x640xf32>
    %cst_16 = arith.constant 0.000000e+00 : f32
    %21 = vector.broadcast %cst_16 : f32 to vector<8x640xf32>
    %22 = arith.maximumf %20, %21 : vector<8x640xf32>
    %23 = arith.truncf %22 : vector<8x640xf32> to vector<8x640xbf16>
    %c0_17 = arith.constant 0 : index
    %c0_18 = arith.constant 0 : index
    %24 = vector.load %arg8[%c0_17, %c0_18] : memref<640x128xbf16, #tpu.memory_space<vmem>>, vector<640x128xbf16>
    %cst_19 = arith.constant dense<0.000000e+00> : vector<8x128xf32>
    %25 = tpu.matmul %23, %24, %cst_19 {dimension_numbers = #tpu.dot_dimension_numbers<[1], [0], [0], [1], [0, 0, 1, 1], [], []>} : vector<8x640xbf16>, vector<640x128xbf16>, vector<8x128xf32> -> vector<8x128xf32>
    %c0_20 = arith.constant 0 : index
    %c0_21 = arith.constant 0 : index
    %26 = vector.load %arg9[%c0_20, %c0_21] : memref<1x128xf32, #tpu.memory_space<vmem>>, vector<1x128xf32>
    %27 = vector.broadcast %26 : vector<1x128xf32> to vector<8x128xf32>
    %28 = arith.addf %25, %27 : vector<8x128xf32>
    %29 = tpu.iota {dimensions = array<i32: 1>} : vector<8x128xi32>
    %c6_i32 = arith.constant 6 : i32
    %30 = vector.broadcast %c6_i32 : i32 to vector<8x128xi32>
    %31 = arith.cmpi slt, %29, %30 : vector<8x128xi32>
    %cst_22 = arith.constant 0.000000e+00 : f32
    %32 = vector.broadcast %cst_22 : f32 to vector<8x128xf32>
    %33 = arith.select %31, %28, %32 : vector<8x128xi1>, vector<8x128xf32>
    %cst_23 = arith.constant dense<0.000000e+00> : vector<8xf32>
    %34 = vector.multi_reduction <add>, %33, %cst_23 [1] : vector<8x128xf32> to vector<8xf32>
    %35 = vector.shape_cast %34 : vector<8xf32> to vector<8x1xf32>
    %cst_24 = arith.constant 0.166666672 : f32
    %36 = vector.broadcast %cst_24 : f32 to vector<8x1xf32>
    %37 = arith.mulf %35, %36 : vector<8x1xf32>
    %c6_i32_25 = arith.constant 6 : i32
    %38 = vector.broadcast %c6_i32_25 : i32 to vector<8x128xi32>
    %39 = arith.cmpi eq, %29, %38 : vector<8x128xi32>
    %cst_26 = arith.constant 0.000000e+00 : f32
    %40 = vector.broadcast %cst_26 : f32 to vector<8x128xf32>
    %41 = arith.select %39, %28, %40 : vector<8x128xi1>, vector<8x128xf32>
    %cst_27 = arith.constant dense<0.000000e+00> : vector<8xf32>
    %42 = vector.multi_reduction <add>, %41, %cst_27 [1] : vector<8x128xf32> to vector<8xf32>
    %43 = vector.shape_cast %42 : vector<8xf32> to vector<8x1xf32>
    %44 = vector.broadcast %43 : vector<8x1xf32> to vector<8x128xf32>
    %45 = arith.addf %44, %28 : vector<8x128xf32>
    %46 = vector.broadcast %37 : vector<8x1xf32> to vector<8x128xf32>
    %47 = arith.subf %45, %46 : vector<8x128xf32>
    %c0_28 = arith.constant 0 : index
    %c0_29 = arith.constant 0 : index
    %48 = vector.load %arg10[%c0_28, %c0_29] : memref<8x128xf32, #tpu.memory_space<vmem>>, vector<8x128xf32>
    tpu.vector_store %arg10[%c0_28, %c0_29], %47 {strides = array<i32>} : memref<8x128xf32, #tpu.memory_space<vmem>>, vector<8x128xf32>,
    return
  }
  func.func @transform_0(%arg0: i32) -> (i32, i32) {
    %c0_i32 = arith.constant 0 : i32
    %c0_i32_0 = arith.constant 0 : i32
    return %arg0, %c0_i32 : i32, i32
  }
  func.func @transform_1(%arg0: i32) -> (i32, i32) {
    %c0_i32 = arith.constant 0 : i32
    %c0_i32_0 = arith.constant 0 : i32
    %c0_i32_1 = arith.constant 0 : i32
    return %c0_i32, %c0_i32_0 : i32, i32
  }
  func.func @transform_2(%arg0: i32) -> (i32, i32) {
    %c0_i32 = arith.constant 0 : i32
    %c0_i32_0 = arith.constant 0 : i32
    %c0_i32_1 = arith.constant 0 : i32
    return %c0_i32, %c0_i32_0 : i32, i32
  }
  func.func @transform_3(%arg0: i32) -> (i32, i32) {
    %c0_i32 = arith.constant 0 : i32
    %c0_i32_0 = arith.constant 0 : i32
    %c0_i32_1 = arith.constant 0 : i32
    return %c0_i32, %c0_i32_0 : i32, i32
  }
  func.func @transform_4(%arg0: i32) -> (i32, i32) {
    %c0_i32 = arith.constant 0 : i32
    %c0_i32_0 = arith.constant 0 : i32
    %c0_i32_1 = arith.constant 0 : i32
    return %c0_i32, %c0_i32_0 : i32, i32
  }
  func.func @transform_5(%arg0: i32) -> (i32, i32) {
    %c0_i32 = arith.constant 0 : i32
    %c0_i32_0 = arith.constant 0 : i32
    %c0_i32_1 = arith.constant 0 : i32
    return %c0_i32, %c0_i32_0 : i32, i32
  }
  func.func @transform_6(%arg0: i32) -> (i32, i32) {
    %c0_i32 = arith.constant 0 : i32
    %c0_i32_0 = arith.constant 0 : i32
    %c0_i32_1 = arith.constant 0 : i32
    return %c0_i32, %c0_i32_0 : i32, i32
  }
  func.func @transform_7(%arg0: i32) -> (i32, i32) {
    %c0_i32 = arith.constant 0 : i32
    %c0_i32_0 = arith.constant 0 : i32
    %c0_i32_1 = arith.constant 0 : i32
    return %c0_i32, %c0_i32_0 : i32, i32
  }
  func.func @transform_8(%arg0: i32) -> (i32, i32) {
    %c0_i32 = arith.constant 0 : i32
    %c0_i32_0 = arith.constant 0 : i32
    %c0_i32_1 = arith.constant 0 : i32
    return %c0_i32, %c0_i32_0 : i32, i32
  }
  func.func @transform_9(%arg0: i32) -> (i32, i32) {
    %c0_i32 = arith.constant 0 : i32
    %c0_i32_0 = arith.constant 0 : i32
    return %arg0, %c0_i32 : i32, i32
  }
}

module attributes {stable_mosaic.version = 11 : i64} {
  func.func @dueling_dqn_kernel(%arg0: i32, %arg1: memref<8x16xf32, #tpu.memory_space<vmem>>, %arg2: memref<16x1024xbf16, #tpu.memory_space<vmem>>, %arg3: memref<1x1024xf32, #tpu.memory_space<vmem>>, %arg4: memref<1024x128xbf16, #tpu.memory_space<vmem>>, %arg5: memref<1x128xf32, #tpu.memory_space<vmem>>, %arg6: memref<128x640xbf16, #tpu.memory_space<vmem>>, %arg7: memref<1x640xf32, #tpu.memory_space<vmem>>, %arg8: memref<640x128xbf16, #tpu.memory_space<vmem>>, %arg9: memref<1x128xf32, #tpu.memory_space<vmem>>, %arg10: memref<8x128xf32, #tpu.memory_space<vmem>>) attributes {dimension_semantics = [#tpu.dimension_semantics<parallel>], iteration_bounds = array<i64: 1>, scalar_prefetch = 0 : i64, scratch_operands = 0 : i64, tpu.core_type = #tpu.core_type<tc>, window_params = [{transform_indices = @transform_0, window_bounds = array<i64: 8, 16>}, {pipeline_mode = #tpu.pipeline_mode<synchronous>, transform_indices = @transform_1, window_bounds = array<i64: 16, 1024>}, {pipeline_mode = #tpu.pipeline_mode<synchronous>, transform_indices = @transform_2, window_bounds = array<i64: 1, 1024>}, {pipeline_mode = #tpu.pipeline_mode<synchronous>, transform_indices = @transform_3, window_bounds = array<i64: 1024, 128>}, {pipeline_mode = #tpu.pipeline_mode<synchronous>, transform_indices = @transform_4, window_bounds = array<i64: 1, 128>}, {pipeline_mode = #tpu.pipeline_mode<synchronous>, transform_indices = @transform_5, window_bounds = array<i64: 128, 640>}, {pipeline_mode = #tpu.pipeline_mode<synchronous>, transform_indices = @transform_6, window_bounds = array<i64: 1, 640>}, {pipeline_mode = #tpu.pipeline_mode<synchronous>, transform_indices = @transform_7, window_bounds = array<i64: 640, 128>}, {pipeline_mode = #tpu.pipeline_mode<synchronous>, transform_indices = @transform_8, window_bounds = array<i64: 1, 128>}, {transform_indices = @transform_9, window_bounds = array<i64: 8, 128>}]} {
    %c0 = arith.constant 0 : index
    %c0_0 = arith.constant 0 : index
    %0 = vector.load %arg1[%c0, %c0_0] : memref<8x16xf32, #tpu.memory_space<vmem>>, vector<8x16xf32>
    %1 = arith.truncf %0 : vector<8x16xf32> to vector<8x16xbf16>
    %c0_1 = arith.constant 0 : index
    %c0_2 = arith.constant 0 : index
    %2 = vector.load %arg2[%c0_1, %c0_2] : memref<16x1024xbf16, #tpu.memory_space<vmem>>, vector<16x1024xbf16>
    %cst = arith.constant dense<0.000000e+00> : vector<8x1024xf32>
    %3 = tpu.matmul %1, %2, %cst {dimension_numbers = #tpu.dot_dimension_numbers<[1], [0], [0], [1], [0, 0, 1, 1], [], []>} : vector<8x16xbf16>, vector<16x1024xbf16>, vector<8x1024xf32> -> vector<8x1024xf32>
    %c0_3 = arith.constant 0 : index
    %c0_4 = arith.constant 0 : index
    %4 = vector.load %arg3[%c0_3, %c0_4] : memref<1x1024xf32, #tpu.memory_space<vmem>>, vector<1x1024xf32>
    %5 = vector.broadcast %4 : vector<1x1024xf32> to vector<8x1024xf32>
    %6 = arith.addf %3, %5 : vector<8x1024xf32>
    %cst_5 = arith.constant 0.000000e+00 : f32
    %7 = vector.broadcast %cst_5 : f32 to vector<8x1024xf32>
    %8 = arith.maximumf %6, %7 : vector<8x1024xf32>
    %9 = arith.truncf %8 : vector<8x1024xf32> to vector<8x1024xbf16>
    %c0_6 = arith.constant 0 : index
    %c0_7 = arith.constant 0 : index
    %10 = vector.load %arg4[%c0_6, %c0_7] : memref<1024x128xbf16, #tpu.memory_space<vmem>>, vector<1024x128xbf16>
    %cst_8 = arith.constant dense<0.000000e+00> : vector<8x128xf32>
    %11 = tpu.matmul %9, %10, %cst_8 {dimension_numbers = #tpu.dot_dimension_numbers<[1], [0], [0], [1], [0, 0, 1, 1], [], []>} : vector<8x1024xbf16>, vector<1024x128xbf16>, vector<8x128xf32> -> vector<8x128xf32>
    %c0_9 = arith.constant 0 : index
    %c0_10 = arith.constant 0 : index
    %12 = vector.load %arg5[%c0_9, %c0_10] : memref<1x128xf32, #tpu.memory_space<vmem>>, vector<1x128xf32>
    %13 = vector.broadcast %12 : vector<1x128xf32> to vector<8x128xf32>
    %14 = arith.addf %11, %13 : vector<8x128xf32>
    %15 = arith.truncf %14 : vector<8x128xf32> to vector<8x128xbf16>
    %c0_11 = arith.constant 0 : index
    %c0_12 = arith.constant 0 : index
    %16 = vector.load %arg6[%c0_11, %c0_12] : memref<128x640xbf16, #tpu.memory_space<vmem>>, vector<128x640xbf16>
    %cst_13 = arith.constant dense<0.000000e+00> : vector<8x640xf32>
    %17 = tpu.matmul %15, %16, %cst_13 {dimension_numbers = #tpu.dot_dimension_numbers<[1], [0], [0], [1], [0, 0, 1, 1], [], []>} : vector<8x128xbf16>, vector<128x640xbf16>, vector<8x640xf32> -> vector<8x640xf32>
    %c0_14 = arith.constant 0 : index
    %c0_15 = arith.constant 0 : index
    %18 = vector.load %arg7[%c0_14, %c0_15] : memref<1x640xf32, #tpu.memory_space<vmem>>, vector<1x640xf32>
    %19 = vector.broadcast %18 : vector<1x640xf32> to vector<8x640xf32>
    %20 = arith.addf %17, %19 : vector<8x640xf32>
    %cst_16 = arith.constant 0.000000e+00 : f32
    %21 = vector.broadcast %cst_16 : f32 to vector<8x640xf32>
    %22 = arith.maximumf %20, %21 : vector<8x640xf32>
    %23 = arith.truncf %22 : vector<8x640xf32> to vector<8x640xbf16>
    %c0_17 = arith.constant 0 : index
    %c0_18 = arith.constant 0 : index
    %24 = vector.load %arg8[%c0_17, %c0_18] : memref<640x128xbf16, #tpu.memory_space<vmem>>, vector<640x128xbf16>
    %cst_19 = arith.constant dense<0.000000e+00> : vector<8x128xf32>
    %25 = tpu.matmul %23, %24, %cst_19 {dimension_numbers = #tpu.dot_dimension_numbers<[1], [0], [0], [1], [0, 0, 1, 1], [], []>} : vector<8x640xbf16>, vector<640x128xbf16>, vector<8x128xf32> -> vector<8x128xf32>
    %c0_20 = arith.constant 0 : index
    %c0_21 = arith.constant 0 : index
    %26 = vector.load %arg9[%c0_20, %c0_21] : memref<1x128xf32, #tpu.memory_space<vmem>>, vector<1x128xf32>
    %27 = vector.broadcast %26 : vector<1x128xf32> to vector<8x128xf32>
    %28 = arith.addf %25, %27 : vector<8x128xf32>
    %29 = tpu.iota {dimensions = array<i32: 1>} : vector<8x128xi32>
    %c6_i32 = arith.constant 6 : i32
    %30 = vector.broadcast %c6_i32 : i32 to vector<8x128xi32>
    %31 = arith.cmpi slt, %29, %30 : vector<8x128xi32>
    %cst_22 = arith.constant 0.000000e+00 : f32
    %32 = vector.broadcast %cst_22 : f32 to vector<8x128xf32>
    %33 = arith.select %31, %28, %32 : vector<8x128xi1>, vector<8x128xf32>
    %cst_23 = arith.constant dense<0.000000e+00> : vector<8xf32>
    %34 = vector.multi_reduction <add>, %33, %cst_23 [1] : vector<8x128xf32> to vector<8xf32>
    %35 = vector.shape_cast %34 : vector<8xf32> to vector<8x1xf32>
    %cst_24 = arith.constant 0.166666672 : f32
    %36 = vector.broadcast %cst_24 : f32 to vector<8x1xf32>
    %37 = arith.mulf %35, %36 : vector<8x1xf32>
    %c6_i32_25 = arith.constant 6 : i32
    %38 = vector.broadcast %c6_i32_25 : i32 to vector<8x128xi32>
    %39 = arith.cmpi eq, %29, %38 : vector<8x128xi32>
    %cst_26 = arith.constant 0.000000e+00 : f32
    %40 = vector.broadcast %cst_26 : f32 to vector<8x128xf32>
    %41 = arith.select %39, %28, %40 : vector<8x128xi1>, vector<8x128xf32>
    %cst_27 = arith.constant dense<0.000000e+00> : vector<8xf32>
    %42 = vector.multi_reduction <add>, %41, %cst_27 [1] : vector<8x128xf32> to vector<8xf32>
    %43 = vector.shape_cast %42 : vector<8xf32> to vector<8x1xf32>
    %44 = vector.broadcast %43 : vector<8x1xf32> to vector<8x128xf32>
    %45 = arith.addf %44, %28 : vector<8x128xf32>
    %46 = vector.broadcast %37 : vector<8x1xf32> to vector<8x128xf32>
    %47 = arith.subf %45, %46 : vector<8x128xf32>
    %c0_28 = arith.constant 0 : index
    %c0_29 = arith.constant 0 : index
    %48 = vector.load %arg10[%c0_28, %c0_29] : memref<8x128xf32, #tpu.memory_space<vmem>>, vector<8x128xf32>
    tpu.vector_store %arg10[%c0_28, %c0_29], %47 {strides = array<i32>} : memref<8x128xf32, #tpu.memory_space<vmem>>, vector<8x128xf32>,
    return
  }
  func.func @transform_0(%arg0: i32) -> (i32, i32) {
    %c0_i32 = arith.constant 0 : i32
    %c0_i32_0 = arith.constant 0 : i32
    return %arg0, %c0_i32 : i32, i32
  }
  func.func @transform_1(%arg0: i32) -> (i32, i32) {
    %c0_i32 = arith.constant 0 : i32
    %c0_i32_0 = arith.constant 0 : i32
    %c0_i32_1 = arith.constant 0 : i32
    return %c0_i32, %c0_i32_0 : i32, i32
  }
  func.func @transform_2(%arg0: i32) -> (i32, i32) {
    %c0_i32 = arith.constant 0 : i32
    %c0_i32_0 = arith.constant 0 : i32
    %c0_i32_1 = arith.constant 0 : i32
    return %c0_i32, %c0_i32_0 : i32, i32
  }
  func.func @transform_3(%arg0: i32) -> (i32, i32) {
    %c0_i32 = arith.constant 0 : i32
    %c0_i32_0 = arith.constant 0 : i32
    %c0_i32_1 = arith.constant 0 : i32
    return %c0_i32, %c0_i32_0 : i32, i32
  }
  func.func @transform_4(%arg0: i32) -> (i32, i32) {
    %c0_i32 = arith.constant 0 : i32
    %c0_i32_0 = arith.constant 0 : i32
    %c0_i32_1 = arith.constant 0 : i32
    return %c0_i32, %c0_i32_0 : i32, i32
  }
  func.func @transform_5(%arg0: i32) -> (i32, i32) {
    %c0_i32 = arith.constant 0 : i32
    %c0_i32_0 = arith.constant 0 : i32
    %c0_i32_1 = arith.constant 0 : i32
    return %c0_i32, %c0_i32_0 : i32, i32
  }
  func.func @transform_6(%arg0: i32) -> (i32, i32) {
    %c0_i32 = arith.constant 0 : i32
    %c0_i32_0 = arith.constant 0 : i32
    %c0_i32_1 = arith.constant 0 : i32
    return %c0_i32, %c0_i32_0 : i32, i32
  }
  func.func @transform_7(%arg0: i32) -> (i32, i32) {
    %c0_i32 = arith.constant 0 : i32
    %c0_i32_0 = arith.constant 0 : i32
    %c0_i32_1 = arith.constant 0 : i32
    return %c0_i32, %c0_i32_0 : i32, i32
  }
  func.func @transform_8(%arg0: i32) -> (i32, i32) {
    %c0_i32 = arith.constant 0 : i32
    %c0_i32_0 = arith.constant 0 : i32
    %c0_i32_1 = arith.constant 0 : i32
    return %c0_i32, %c0_i32_0 : i32, i32
  }
  func.func @transform_9(%arg0: i32) -> (i32, i32) {
    %c0_i32 = arith.constant 0 : i32
    %c0_i32_0 = arith.constant 0 : i32
    return %arg0, %c0_i32 : i32, i32
  }
}

</mosaic_0001>

<bundles_post_ra>
// kernel: tpu_custom_call.1
= control target key start
LH: loop header
LB: loop body
LE: loop exit
PB: predicated region body
PF: predicated region fallthrough
CT: control target
= control target key end

     0   :  { %14 = vsyncpa [#allocation3], 0  ;;  %s2826_s0 = inlined_call_operand.hbm [shape: f32[2,16], index: 0, kind: input, shape index: {}]   ;;  %s2827_s1 = inlined_call_operand.hbm [shape: bf16[16,1024], index: 1, kind: input, shape index: {}]   ;;  %s2828_s2 = inlined_call_operand.hbm [shape: f32[1,1024], index: 2, kind: input, shape index: {}]   ;;  %s2829_s3 = inlined_call_operand.hbm [shape: bf16[1024,128], index: 3, kind: input, shape index: {}]   ;;  %s2830_s4 = inlined_call_operand.vmem [shape: f32[1,128], index: 4, kind: input, shape index: {}]   ;;  %s2831_s5 = inlined_call_operand.hbm [shape: bf16[128,640], index: 5, kind: input, shape index: {}]   ;;  %s2832_s6 = inlined_call_operand.vmem [shape: f32[1,640], index: 6, kind: input, shape index: {}]   ;;  %s2833_s7 = inlined_call_operand.hbm [shape: bf16[640,128], index: 7, kind: input, shape index: {}]   ;;  %s2834_s8 = inlined_call_operand.vmem [shape: f32[1,128], index: 8, kind: input, shape index: {}]   ;;  %s2835_s9 = inlined_call_operand.hbm [shape: f32[2,128], index: 9, kind: output, shape index: {}]  }
   0x1   :  { %15 = vsyncpa [#allocation6], 0 }
   0x2   :  { %16 = vsyncpa [#allocation9], 0 }
   0x3   :  { %17 = vsyncpa [#allocation12], 0 }
   0x4   :  { %18 = vsyncpa [#allocation4], 0 }
   0x5   :  { %23 = vsyncadd [#allocation3], 96  ;;  %s2641_s30 = smov [#allocation5]  }
   0x6   :  { %s36_s10 = sshll.u32 %s2641_s30, 4  ;;  %s37_s10 = int_to_ptr.vmem [resolvable:$true] %s36_s10 }
   0x7   :  { %s2499_s11 = scalar_lea.vmem %s37_s10, 1024  ;;  %p2504_p1 = scmp.lt.s32.totalorder %s37_s10, %s37_s10 }
   0x8   :  { %p2500_p0 = scmp.ne.s32.totalorder %s37_s10, %s2499_s11  ;;  %p2505_p2 = scmp.lt.s32.totalorder %s2499_s11, %s2499_s11 }
   0xa   :  { %p2506_p3 = por %p2505_p2, %p2504_p1 }
   0xc   :  { %p2507_p4 = pnand %p2506_p3, %p2500_p0 }
   0xe   :  { %2510 = shalt.err (!%p2507_p4)
}
   0xf   :  { %s2642_s12 = smov 512   ;;  %s2643_s13 = smov 32  }
  0x10   :  { %42 = dma.hbm_to_vmem [thread:$0]  %s2827_s1, 1024, %s37_s10, [#allocation6], %s2642_s12, %s2642_s12, %s2643_s13  }
  0x11   :  { %s2644_s16 = smov [#allocation8]  }
  0x12   :  { %s58_s17 = sshll.u32 %s2644_s16, 4  ;;  %s59_s17 = int_to_ptr.vmem [resolvable:$true] %s58_s17 }
  0x13   :  { %s2519_s18 = scalar_lea.vmem %s59_s17, 8192  ;;  %p2524_p6 = scmp.lt.s32.totalorder %s59_s17, %s59_s17 }
  0x14   :  { %p2520_p5 = scmp.ne.s32.totalorder %s59_s17, %s2519_s18  ;;  %p2525_p7 = scmp.lt.s32.totalorder %s2519_s18, %s2519_s18 }
  0x16   :  { %p2526_p8 = por %p2525_p7, %p2524_p6 }
  0x18   :  { %p2527_p9 = pnand %p2526_p8, %p2520_p5 }
  0x1a   :  { %2530 = shalt.err (!%p2527_p9)
}
  0x1b   :  { %s2645_s19 = smov 64   ;;  %s2646_s20 = smov 4  }
  0x1c   :  { %64 = dma.hbm_to_vmem [thread:$0]  %s2829_s3, 8192, %s59_s17, [#allocation9], %s2645_s19, %s2645_s19, %s2646_s20  }
  0x1d   :  { %s2647_s1 = smov [#allocation2]   ;;  %s2648_s24 = smov [#allocation7]  }
  0x1e   :  { %s24_s23 = sshll.u32 %s2647_s1, 4  ;;  %s49_s25 = sshll.u32 %s2648_s24, 4  ;;  %s25_s23 = int_to_ptr.vmem [resolvable:$true] %s24_s23  ;;  %s50_s25 = int_to_ptr.vmem [resolvable:$true] %s49_s25 }
  0x1f   :  { %s2539_s26 = scalar_lea.vmem %s25_s23, 32  ;;  %s2543_s27 = scalar_lea.vmem %s25_s23, 128 }
  0x20   :  { %p2540_p10 = scmp.ne.s32.totalorder %s25_s23, %s2539_s26  ;;  %p2544_p11 = scmp.lt.s32.totalorder %s25_s23, %s25_s23 }
  0x21   :  { %p2545_p12 = scmp.lt.s32.totalorder %s2543_s27, %s2539_s26 }
  0x23   :  { %p2546_p13 = por %p2545_p12, %p2544_p11 }
  0x25   :  { %p2547_p0 = pnand %p2546_p13, %p2540_p10 }
  0x27   :  { %2550 = shalt.err (!%p2547_p0)
}
  0x28   :  { %s2649_s28 = smov 2   ;;  %s2559_s3 = scalar_lea.vmem %s50_s25, 128 }
  0x29   :  { %30 = dma.hbm_to_vmem [thread:$0]  %s2826_s0, 32, %s25_s23, [#allocation3], %s2643_s13, %s2643_s13, %s2649_s28  }
  0x2a   :  { %p2560_p1 = scmp.ne.s32.totalorder %s50_s25, %s2559_s3  ;;  %p2564_p2 = scmp.lt.s32.totalorder %s50_s25, %s50_s25 }
  0x2b   :  { %p2565_p3 = scmp.lt.s32.totalorder %s2559_s3, %s2559_s3 }
  0x2d   :  { %p2566_p4 = por %p2565_p3, %p2564_p2 }
  0x2f   :  { %p2567_p5 = pnand %p2566_p4, %p2560_p1 }
  0x31   :  { %2570 = shalt.err (!%p2567_p5)
}
  0x32   :  { %52 = dma.hbm_to_vmem [thread:$0]  %s2828_s2, 128, %s50_s25, [#allocation6]  }
  0x33   :  { %s2650_s12 = smov [#allocation10]  }
  0x34   :  { %s72_s14 = sshll.u32 %s2650_s12, 4  ;;  %s73_s14 = int_to_ptr.vmem [resolvable:$true] %s72_s14 }
  0x35   :  { %s2579_s15 = scalar_lea.vmem %s73_s14, 5120  ;;  %p2584_p7 = scmp.lt.s32.totalorder %s73_s14, %s73_s14 }
  0x36   :  { %p2580_p6 = scmp.ne.s32.totalorder %s73_s14, %s2579_s15  ;;  %p2585_p8 = scmp.lt.s32.totalorder %s2579_s15, %s2579_s15 }
  0x38   :  { %p2586_p9 = por %p2585_p8, %p2584_p7 }
  0x3a   :  { %p2587_p10 = pnand %p2586_p9, %p2580_p6 }
  0x3c   :  { %2590 = shalt.err (!%p2587_p10)
}
  0x3d   :  { %s2651_s0 = smov 320   ;;  %s2652_s16 = smov 20  }
  0x3e   :  { %78 = dma.hbm_to_vmem [thread:$0]  %s2831_s5, 5120, %s73_s14, [#allocation9], %s2651_s0, %s2651_s0, %s2652_s16  }
  0x3f   :  { %s2653_s21 = smov [#allocation11]  }
  0x40   :  { %s86_s22 = sshll.u32 %s2653_s21, 4  ;;  %s87_s22 = int_to_ptr.vmem [resolvable:$true] %s86_s22 }
  0x41   :  { %s2599_s2 = scalar_lea.vmem %s87_s22, 5120  ;;  %p2604_p12 = scmp.lt.s32.totalorder %s87_s22, %s87_s22 }
  0x42   :  { %p2600_p11 = scmp.ne.s32.totalorder %s87_s22, %s2599_s2  ;;  %p2605_p13 = scmp.lt.s32.totalorder %s2599_s2, %s2599_s2 }
  0x44   :  { %p2606_p0 = por %p2605_p13, %p2604_p12 }
  0x46   :  { %p2607_p1 = pnand %p2606_p0, %p2600_p11 }
  0x48   :  { %2610 = shalt.err (!%p2607_p1)
}
  0x49   :  { %92 = dma.hbm_to_vmem [thread:$0]  %s2833_s7, 5120, %s87_s22, [#allocation12], %s2645_s19, %s2645_s19, %s2646_s20  }
  0x4a   :  { %2631 = dma.done.wait [#allocation3], 128  }
  0x4b   :  { %2632 = vsyncadd [#allocation3], 4294967168 }
  0x4c   :  { %2633 = dma.done.wait [#allocation6], 1152  }
  0x4d   :  { %2634 = vsyncadd [#allocation6], 4294966144 }
  0x4e   :  { %2635 = dma.done.wait [#allocation9], 13312  }
  0x4f   :  { %2636 = vsyncadd [#allocation9], 4294953984 }
  0x50   :  { %2637 = dma.done.wait [#allocation12], 5120  }
  0x51   :  { %2638 = vsyncadd [#allocation12], 4294962176  ;;  %v2654_v0 = vmov 0   ;;  %v116_v1 = vld [vmem:[#allocation5] sm:$0xff]  ;;  %v117_v3 = vld [vmem:[#allocation5 + $0x8] sm:$0xff]  ;;  %vm206_vm0 = vcmask 130048   ;;  %v126_v53 = vlaneseq }
  0x52   :  { %242 = vmatprep.mubr.bf16.mxu0 %v2654_v0  ;;  %283 = vmatprep.mubr.bf16.mxu1 %v2654_v0  ;;  %v120_v2 = vld [vmem:[#allocation5 + $0x20] sm:$0xff]  ;;  %v121_v5 = vld [vmem:[#allocation5 + $0x28] sm:$0xff]  ;;  %v114_v7 = vld [vmem:[#allocation2] sm:$0xff]  ;;  %vm2656_vm1 = vmmov 0  }
  0x53   :  { %v1967_v4 = vcombine.high %v116_v1, %v120_v2  ;;  %v1966_v6 = vcombine.low %v116_v1, %v120_v2  ;;  %v118_v8 = vld [vmem:[#allocation5 + $0x10] sm:$0xff]  ;;  %v1969_v9 = vcombine.high %v117_v3, %v121_v5  ;;  %v1968_v10 = vcombine.low %v117_v3, %v121_v5  ;;  %v119_v12 = vld [vmem:[#allocation5 + $0x18] sm:$0xff]  ;;  %v2331_v19 = vld [vmem:[#allocation8 + $0x78] sm:$0xff]  }
  0x54   :  { %v122_v11 = vld [vmem:[#allocation5 + $0x30] sm:$0xff]  ;;  %v123_v13 = vld [vmem:[#allocation5 + $0x38] sm:$0xff]  ;;  %v115_v14 = vpack.c.bf16 %v114_v7, %v114_v7  ;;  %v2332_v20 = vld [vmem:[#allocation8 + $0xf8] sm:$0xff]   ;;  %v2745_v54 = vshrl.u32 %v126_v53, 7 }
  0x55   :  { %224 = vmatprep.subr.bf16.mxu0 %v1967_v4  ;;  %v1971_v15 = vcombine.high %v118_v8, %v122_v11  ;;  %v1973_v16 = vcombine.high %v119_v12, %v123_v13  ;;  %265 = vmatprep.subr.bf16.mxu1 %v1969_v9  ;;  %v1970_v17 = vcombine.low %v118_v8, %v122_v11  ;;  %v2333_v21 = vld [vmem:[#allocation8 + $0x38] sm:$0xff]   ;;  %v2335_v23 = vld [vmem:[#allocation8 + $0x70] sm:$0xff]   ;;  %v2339_v27 = vld [vmem:[#allocation8 + $0x68] sm:$0xff]  }
  0x56   :  { %225 = vmatpush1.bf16.msra.mxu0 %v1966_v6  ;;  %266 = vmatpush1.bf16.msra.mxu1 %v1968_v10  ;;  %v1972_v18 = vcombine.low %v119_v12, %v123_v13  ;;  %v2334_v22 = vld [vmem:[#allocation8 + $0xb8] sm:$0xff]   ;;  %v2336_v24 = vld [vmem:[#allocation8 + $0xf0] sm:$0xff]   ;;  %v2340_v28 = vld [vmem:[#allocation8 + $0xe8] sm:$0xff]   ;;  %v128_v55 = vsub.s32 0, %v2745_v54  ;;  %v136_v57 = vsub.s32 2, %v2745_v54  ;;  %v132_v58 = vsub.s32 1, %v2745_v54 }
  0x57   :  { %306 = vmatprep.subr.bf16.mxu0 %v1971_v15  ;;  %347 = vmatprep.subr.bf16.mxu1 %v1973_v16  ;;  %v2337_v25 = vld [vmem:[#allocation8 + $0x30] sm:$0xff]   ;;  %v2341_v29 = vld [vmem:[#allocation8 + $0x28] sm:$0xff]   ;;  %v2343_v31 = vld [vmem:[#allocation8 + $0x60] sm:$0xff]   ;;  %v140_v59 = vsub.s32 3, %v2745_v54  ;;  %v148_v8 = vsub.s32 5, %v2745_v54  ;;  %v156_v13 = vsub.s32 7, %v2745_v54 }
  0x58   :  { %v2338_v26 = vld [vmem:[#allocation8 + $0xb0] sm:$0xff]   ;;  %v2342_v30 = vld [vmem:[#allocation8 + $0xa8] sm:$0xff]   ;;  %v2344_v32 = vld [vmem:[#allocation8 + $0xe0] sm:$0xff]  }
  0x59   :  { %1974 = vmatmul.mubr.msk.bf16.vlgmr.msra.gmra.mxu0 %vm206_vm0, %v115_v14  ;;  %1975 = vmatmul.mubr.msk.bf16.vlgmr.msra.gmra.mxu1 %vm206_vm0, %v115_v14  ;;  %v2345_v33 = vld [vmem:[#allocation8 + $0x20] sm:$0xff]   ;;  %v2347_v35 = vld [vmem:[#allocation8 + $0x58] sm:$0xff]   ;;  %v2351_v39 = vld [vmem:[#allocation8 + $0x50] sm:$0xff]  }
  0x5a   :  { %307 = vmatpush1.bf16.msra.mxu0 %v1970_v17  ;;  %324 = vmatprep.mubr.bf16.mxu0 %v2654_v0  ;;  %v2346_v34 = vld [vmem:[#allocation8 + $0xa0] sm:$0xff]   ;;  %v2348_v36 = vld [vmem:[#allocation8 + $0xd8] sm:$0xff]   ;;  %v2352_v40 = vld [vmem:[#allocation8 + $0xd0] sm:$0xff]  }
  0x5b   :  { %348 = vmatpush1.bf16.msra.mxu1 %v1972_v18  ;;  %365 = vmatprep.mubr.bf16.mxu1 %v2654_v0  ;;  %v2349_v37 = vld [vmem:[#allocation8 + $0x18] sm:$0xff]   ;;  %v2353_v41 = vld [vmem:[#allocation8 + $0x10] sm:$0xff]   ;;  %v2355_v43 = vld [vmem:[#allocation8 + $0x48] sm:$0xff]  }
  0x5c   :  { %2124 = vmatprep.subr.bf16.mxu0 %v2331_v19  ;;  %2146 = vmatprep.subr.bf16.mxu1 %v2332_v20  ;;  %v2350_v38 = vld [vmem:[#allocation8 + $0x98] sm:$0xff]   ;;  %v2354_v42 = vld [vmem:[#allocation8 + $0x90] sm:$0xff]   ;;  %v2356_v44 = vld [vmem:[#allocation8 + $0xc8] sm:$0xff]  }
  0x5d   :  { %v2357_v45 = vld [vmem:[#allocation8 + $0x8] sm:$0xff]   ;;  %v2359_v47 = vld [vmem:[#allocation8 + $0x40] sm:$0xff]   ;;  %v2363_v51 = vld [vmem:[#allocation8 + $0x178] sm:$0xff]  }
  0x5e   :  { %v2358_v46 = vld [vmem:[#allocation8 + $0x88] sm:$0xff]   ;;  %v2360_v48 = vld [vmem:[#allocation8 + $0xc0] sm:$0xff]   ;;  %v2364_v52 = vld [vmem:[#allocation8 + $0x1f8] sm:$0xff]  }
  0x5f   :  { %v2361_v49 = vld [vmem:[#allocation8] sm:$0xff]   ;;  %v2748_v56 = vld [vmem:[#allocation7] sm:$0xff] }
  0x60   :  { %v2362_v50 = vld [vmem:[#allocation8 + $0x80] sm:$0xff]   ;;  %v129_v60 = vrot.slane %v2748_v56, %v128_v55  ;;  %v137_v61 = vrot.slane %v2748_v56, %v136_v57  ;;  %v133_v62 = vrot.slane %v2748_v56, %v132_v58  ;;  %v141_v1 = vrot.slane %v2748_v56, %v140_v59 }
  0x61   :  { %1976 = vmatmul.mubr.msk.bf16.vlgmr.msra.gmra.mxu0 %vm206_vm0, %v115_v14  ;;  %1977 = vmatmul.mubr.msk.bf16.vlgmr.msra.gmra.mxu1 %vm206_vm0, %v115_v14 }
  0x62   :  { %2125 = vmatpush3.bf16.msra.mxu0 %v2333_v21  ;;  %2147 = vmatpush3.bf16.msra.mxu1 %v2334_v22  ;;  %v2365_v21 = vld [vmem:[#allocation8 + $0x138] sm:$0xff]   ;;  %v149_v22 = vrot.slane %v2748_v56, %v148_v8  ;;  %v2386_v8 = vld [vmem:[#allocation8 + $0x190] sm:$0xff]  }
  0x63   :  { %2126 = vmatprep.subr.bf16.mxu0 %v2335_v23  ;;  %2148 = vmatprep.subr.bf16.mxu1 %v2336_v24 }
  0x66   :  { %2127 = vmatpush3.bf16.msra.mxu0 %v2337_v25  ;;  %2149 = vmatpush3.bf16.msra.mxu1 %v2338_v26  ;;  %v2366_v25 = vld [vmem:[#allocation8 + $0x1b8] sm:$0xff]   ;;  %v2367_v26 = vld [vmem:[#allocation8 + $0x170] sm:$0xff]  }
  0x67   :  { %2128 = vmatprep.subr.bf16.mxu0 %v2339_v27  ;;  %2150 = vmatprep.subr.bf16.mxu1 %v2340_v28  ;;  %v157_v28 = vrot.slane %v2748_v56, %v156_v13 }
  0x6a   :  { %2129 = vmatpush3.bf16.msra.mxu0 %v2341_v29  ;;  %2151 = vmatpush3.bf16.msra.mxu1 %v2342_v30  ;;  %v2368_v29 = vld [vmem:[#allocation8 + $0x1f0] sm:$0xff]  }
  0x6b   :  { %2130 = vmatprep.subr.bf16.mxu0 %v2343_v31  ;;  %2152 = vmatprep.subr.bf16.mxu1 %v2344_v32  ;;  %v2369_v32 = vld [vmem:[#allocation8 + $0x130] sm:$0xff]  }
  0x6e   :  { %2131 = vmatpush3.bf16.msra.mxu0 %v2345_v33  ;;  %2153 = vmatpush3.bf16.msra.mxu1 %v2346_v34 }
  0x6f   :  { %2132 = vmatprep.subr.bf16.mxu0 %v2347_v35  ;;  %2154 = vmatprep.subr.bf16.mxu1 %v2348_v36  ;;  %v2370_v35 = vld [vmem:[#allocation8 + $0x1b0] sm:$0xff]   ;;  %v2371_v36 = vld [vmem:[#allocation8 + $0x168] sm:$0xff]  }
  0x72   :  { %2133 = vmatpush3.bf16.msra.mxu0 %v2349_v37  ;;  %2155 = vmatpush3.bf16.msra.mxu1 %v2350_v38 }
  0x73   :  { %2134 = vmatprep.subr.bf16.mxu0 %v2351_v39  ;;  %2156 = vmatprep.subr.bf16.mxu1 %v2352_v40  ;;  %v2372_v39 = vld [vmem:[#allocation8 + $0x1e8] sm:$0xff]  }
  0x76   :  { %2135 = vmatpush3.bf16.msra.mxu0 %v2353_v41  ;;  %2157 = vmatpush3.bf16.msra.mxu1 %v2354_v42 }
  0x77   :  { %2136 = vmatprep.subr.bf16.mxu0 %v2355_v43  ;;  %2158 = vmatprep.subr.bf16.mxu1 %v2356_v44  ;;  %v2373_v44 = vld [vmem:[#allocation8 + $0x128] sm:$0xff]  }
  0x7a   :  { %2137 = vmatpush3.bf16.msra.mxu0 %v2357_v45  ;;  %2159 = vmatpush3.bf16.msra.mxu1 %v2358_v46 }
  0x7b   :  { %2138 = vmatprep.subr.bf16.mxu0 %v2359_v47  ;;  %2160 = vmatprep.subr.bf16.mxu1 %v2360_v48  ;;  %v2374_v47 = vld [vmem:[#allocation8 + $0x1a8] sm:$0xff]   ;;  %v2375_v48 = vld [vmem:[#allocation8 + $0x160] sm:$0xff]  }
  0x7e   :  { %2139 = vmatpush3.bf16.msra.mxu0 %v2361_v49  ;;  %2161 = vmatpush3.bf16.msra.mxu1 %v2362_v50  ;;  %v2376_v50 = vld [vmem:[#allocation8 + $0x1e0] sm:$0xff]  }
  0x7f   :  { %2168 = vmatprep.subr.bf16.mxu0 %v2363_v51  ;;  %2190 = vmatprep.subr.bf16.mxu1 %v2364_v52  ;;  %v2377_v51 = vld [vmem:[#allocation8 + $0x120] sm:$0xff]  }
  0x80   :  { %v2378_v52 = vld [vmem:[#allocation8 + $0x1a0] sm:$0xff]  }
 0x119   :  { %v244_v63 = vpop.f32.mrf.mxu0  ;;  %v285_v3 = vpop.f32.mrf.mxu1 }
 0x11a   :  { %v245_v2 = vadd.f32 %v244_v63, %v129_v60  ;;  %v286_v4 = vadd.f32 %v285_v3, %v137_v61  ;;  %v2379_v60 = vld [vmem:[#allocation8 + $0x158] sm:$0xff]   ;;  %v152_v63 = vsub.s32 6, %v2745_v54  ;;  %v2383_v3 = vld [vmem:[#allocation8 + $0x150] sm:$0xff]  }
 0x11b   :  { %v246_v5 = vpop.f32.mrf.mxu0  ;;  %v287_v7 = vpop.f32.mrf.mxu1  ;;  %v2380_v61 = vld [vmem:[#allocation8 + $0x1d8] sm:$0xff]  }
 0x11c   :  { %v247_v6 = vadd.f32 %v246_v5, %v133_v62  ;;  %v374_v9 = vmax.f32 %v245_v2, 0.0  ;;  %v376_v10 = vmax.f32 %v286_v4, 0.0  ;;  %v288_v11 = vadd.f32 %v287_v7, %v141_v1  ;;  %v2381_v62 = vld [vmem:[#allocation8 + $0x118] sm:$0xff]   ;;  %v2384_v4 = vld [vmem:[#allocation8 + $0x1d0] sm:$0xff]  }
 0x11d   :  { %v248_v12 = vpop.f32.mrf.mxu0  ;;  %v289_v15 = vpop.f32.mrf.mxu1  ;;  %v144_v1 = vsub.s32 4, %v2745_v54  ;;  %v2382_v2 = vld [vmem:[#allocation8 + $0x198] sm:$0xff]   ;;  %v153_v5 = vrot.slane %v2748_v56, %v152_v63 }
 0x11e   :  { %v375_v14 = vmax.f32 %v247_v6, 0.0  ;;  %v377_v16 = vmax.f32 %v288_v11, 0.0  ;;  %v384_v18 = vpack.c.bf16 %v376_v10, %v376_v10  ;;  %v382_v23 = vpack.c.bf16 %v374_v9, %v374_v9  ;;  %v2385_v6 = vld [vmem:[#allocation8 + $0x110] sm:$0xff]   ;;  %v2387_v9 = vld [vmem:[#allocation8 + $0x148] sm:$0xff]   ;;  %v2391_v15 = vld [vmem:[#allocation8 + $0x140] sm:$0xff]  }
 0x11f   :  { %v249_v17 = vpop.f32.mrf.mxu0  ;;  %v290_v20 = vpop.f32.mrf.mxu1  ;;  %v145_v7 = vrot.slane %v2748_v56, %v144_v1  ;;  %v2388_v10 = vld [vmem:[#allocation8 + $0x1c8] sm:$0xff]   ;;  %v2393_v56 = vld [vmem:[#allocation8 + $0x100] sm:$0xff]  }
 0x120   :  { %v383_v19 = vpack.c.bf16 %v375_v14, %v375_v14  ;;  %v385_v24 = vpack.c.bf16 %v377_v16, %v377_v16  ;;  %v2389_v12 = vld [vmem:[#allocation8 + $0x108] sm:$0xff]   ;;  %v2392_v16 = vld [vmem:[#allocation8 + $0x1c0] sm:$0xff]  }
 0x121   :  { %v2768_v27 = vpop.f32.mrf.mxu0  ;;  %v367_v30 = vpop.f32.mrf.mxu1  ;;  %v2390_v14 = vld [vmem:[#allocation8 + $0x188] sm:$0xff]  }
 0x122   :  { %941 = vmatprep.mubr.bf16.mxu0 %v383_v19  ;;  %981 = vmatprep.mubr.bf16.mxu1 %v385_v24  ;;  %v368_v11 = vadd.f32 %v367_v30, %v153_v5  ;;  %v327_v13 = vadd.f32 %v2768_v27, %v145_v7  ;;  %v2394_v19 = vld [vmem:[#allocation8 + $0x180] sm:$0xff]   ;;  %v2406_v27 = vld [vmem:[#allocation10 + $0xfc] ss:$20 sps:$4 sm:$0xff]  }
 0x123   :  { %942 = vmatmul.mubr.bf16.vlgmr.msra.gmra.mxu0 %v382_v23  ;;  %v328_v31 = vpop.f32.mrf.mxu0  ;;  %982 = vmatmul.mubr.bf16.vlgmr.msra.gmra.mxu1 %v384_v18  ;;  %v369_v34 = vpop.f32.mrf.mxu1  ;;  %v2397_v23 = vld [vmem:[#allocation10 + $0x11c] ss:$20 sps:$4 sm:$0xff]   ;;  %v2398_v24 = vld [vmem:[#allocation10 + $0x120] ss:$20 sps:$4 sm:$0xff]  }
 0x124   :  { %2169 = vmatpush3.bf16.msra.mxu0 %v2365_v21  ;;  %v329_v33 = vadd.f32 %v328_v31, %v149_v22  ;;  %2191 = vmatpush3.bf16.msra.mxu1 %v2366_v25  ;;  %v370_v38 = vadd.f32 %v369_v34, %v157_v28  ;;  %v380_v17 = vmax.f32 %v368_v11, 0.0  ;;  %v378_v18 = vmax.f32 %v327_v13, 0.0  ;;  %v2395_v22 = vld [vmem:[#allocation10 + $0x118] ss:$20 sps:$4 sm:$0xff]   ;;  %v2401_v28 = vld [vmem:[#allocation10 + $0xf0] ss:$20 sps:$4 sm:$0xff]  }
 0x125   :  { %2170 = vmatprep.subr.bf16.mxu0 %v2367_v26  ;;  %v330_v37 = vpop.f32.mrf.mxu0  ;;  %2192 = vmatprep.subr.bf16.mxu1 %v2368_v29  ;;  %v371_v41 = vpop.f32.mrf.mxu1  ;;  %v2400_v25 = vld [vmem:[#allocation10 + $0x124] ss:$20 sps:$4 sm:$0xff]   ;;  %v2403_v26 = vld [vmem:[#allocation10 + $0xf4] ss:$20 sps:$4 sm:$0xff]   ;;  %v2409_v30 = vld [vmem:[#allocation10 + $0xcc] ss:$20 sps:$4 sm:$0xff]  }
 0x126   :  { %v379_v40 = vmax.f32 %v329_v33, 0.0  ;;  %v381_v42 = vmax.f32 %v370_v38, 0.0  ;;  %v388_v20 = vpack.c.bf16 %v380_v17, %v380_v17  ;;  %v386_v21 = vpack.c.bf16 %v378_v18, %v378_v18  ;;  %v2404_v29 = vld [vmem:[#allocation10 + $0xf8] ss:$20 sps:$4 sm:$0xff]   ;;  %v2412_v31 = vld [vmem:[#allocation10 + $0xd4] ss:$20 sps:$4 sm:$0xff]  }
 0x127   :  { %v331_v43 = vpop.f32.mrf.mxu0  ;;  %v372_v46 = vpop.f32.mrf.mxu1  ;;  %v2415_v33 = vld [vmem:[#allocation10 + $0xa4] ss:$20 sps:$4 sm:$0xff]   ;;  %v2418_v34 = vld [vmem:[#allocation10 + $0xac] ss:$20 sps:$4 sm:$0xff]   ;;  %v2421_v37 = vld [vmem:[#allocation10 + $0x7c] ss:$20 sps:$4 sm:$0xff]  }
 0x128   :  { %2171 = vmatpush3.bf16.msra.mxu0 %v2369_v32  ;;  %v387_v45 = vpack.c.bf16 %v379_v40, %v379_v40  ;;  %2193 = vmatpush3.bf16.msra.mxu1 %v2370_v35  ;;  %v389_v49 = vpack.c.bf16 %v381_v42, %v381_v42  ;;  %v2407_v32 = vld [vmem:[#allocation10 + $0xc8] ss:$20 sps:$4 sm:$0xff]   ;;  %v2413_v35 = vld [vmem:[#allocation10 + $0xa0] ss:$20 sps:$4 sm:$0xff]   ;;  %v2424_v38 = vld [vmem:[#allocation10 + $0x84] ss:$20 sps:$4 sm:$0xff]  }
 0x129   :  { %2172 = vmatprep.subr.bf16.mxu0 %v2371_v36  ;;  %2194 = vmatprep.subr.bf16.mxu1 %v2372_v39  ;;  %v2416_v36 = vld [vmem:[#allocation10 + $0xa8] ss:$20 sps:$4 sm:$0xff]   ;;  %v2419_v39 = vld [vmem:[#allocation10 + $0x78] ss:$20 sps:$4 sm:$0xff]   ;;  %v2422_v40 = vld [vmem:[#allocation10 + $0x80] ss:$20 sps:$4 sm:$0xff]  }
 0x12a   :  { %1021 = vmatprep.mubr.bf16.mxu0 %v387_v45  ;;  %1061 = vmatprep.mubr.bf16.mxu1 %v389_v49  ;;  %v2427_v41 = vld [vmem:[#allocation10 + $0x54] ss:$20 sps:$4 sm:$0xff]   ;;  %v2430_v42 = vld [vmem:[#allocation10 + $0x5c] ss:$20 sps:$4 sm:$0xff]   ;;  %v2433_v45 = vld [vmem:[#allocation10 + $0x2c] ss:$20 sps:$4 sm:$0xff]  }
 0x12b   :  { %v2425_v43 = vld [vmem:[#allocation10 + $0x50] ss:$20 sps:$4 sm:$0xff]   ;;  %v2431_v46 = vld [vmem:[#allocation10 + $0x28] ss:$20 sps:$4 sm:$0xff]  }
 0x12c   :  { %2173 = vmatpush3.bf16.msra.mxu0 %v2373_v44  ;;  %2195 = vmatpush3.bf16.msra.mxu1 %v2374_v47  ;;  %v2428_v44 = vld [vmem:[#allocation10 + $0x58] ss:$20 sps:$4 sm:$0xff]   ;;  %v2436_v47 = vld [vmem:[#allocation10 + $0x34] ss:$20 sps:$4 sm:$0xff]  }
 0x12d   :  { %2174 = vmatprep.subr.bf16.mxu0 %v2375_v48  ;;  %2196 = vmatprep.subr.bf16.mxu1 %v2376_v50  ;;  %v2434_v48 = vld [vmem:[#allocation10 + $0x30] ss:$20 sps:$4 sm:$0xff]   ;;  %v2437_v50 = vld [vmem:[#allocation10] ss:$20 sps:$4 sm:$0xff]  }
 0x12e   :  { %v2439_v49 = vld [vmem:[#allocation10 + $0x4] ss:$20 sps:$4 sm:$0xff]  }
 0x130   :  { %2175 = vmatpush3.bf16.msra.mxu0 %v2377_v51  ;;  %2197 = vmatpush3.bf16.msra.mxu1 %v2378_v52  ;;  %v2442_v51 = vld [vmem:[#allocation10 + $0xc] ss:$20 sps:$4 sm:$0xff]   ;;  %v2440_v52 = vld [vmem:[#allocation10 + $0x8] ss:$20 sps:$4 sm:$0xff]  }
 0x131   :  { %2176 = vmatprep.subr.bf16.mxu0 %v2379_v60  ;;  %2198 = vmatprep.subr.bf16.mxu1 %v2380_v61  ;;  %v2655_v60 = vmov 0.0   ;;  %v2451_v61 = vld [vmem:[#allocation11 + $0x78] sm:$0xff]  }
 0x134   :  { %2177 = vmatpush3.bf16.msra.mxu0 %v2381_v62  ;;  %2199 = vmatpush3.bf16.msra.mxu1 %v2382_v2 }
 0x135   :  { %2178 = vmatprep.subr.bf16.mxu0 %v2383_v3  ;;  %2200 = vmatprep.subr.bf16.mxu1 %v2384_v4 }
 0x138   :  { %2179 = vmatpush3.bf16.msra.mxu0 %v2385_v6  ;;  %2201 = vmatpush3.bf16.msra.mxu1 %v2386_v8 }
 0x139   :  { %2180 = vmatprep.subr.bf16.mxu0 %v2387_v9  ;;  %2202 = vmatprep.subr.bf16.mxu1 %v2388_v10  ;;  %v1978_v9 = vld [vmem:[%s2830_s4] ss:$0 sm:$0xff] }
 0x13c   :  { %2181 = vmatpush3.bf16.msra.mxu0 %v2389_v12  ;;  %2203 = vmatpush3.bf16.msra.mxu1 %v2390_v14 }
 0x13d   :  { %2182 = vmatprep.subr.bf16.mxu0 %v2391_v15  ;;  %2204 = vmatprep.subr.bf16.mxu1 %v2392_v16 }
 0x140   :  { %2183 = vmatpush3.bf16.msra.mxu0 %v2393_v56  ;;  %2205 = vmatpush3.bf16.msra.mxu1 %v2394_v19 }
 0x141   :  { %1353 = vmatprep.subr.bf16.mxu0 %v2397_v23  ;;  %1394 = vmatprep.subr.bf16.mxu1 %v2400_v25 }
 0x143   :  { %1022 = vmatmul.mubr.bf16.vlgmr.msra.gmra.mxu0 %v386_v21  ;;  %1062 = vmatmul.mubr.bf16.vlgmr.msra.gmra.mxu1 %v388_v20 }
 0x144   :  { %1385 = vmatprep.mubr.bf16.mxu0 %v2654_v0  ;;  %1426 = vmatprep.mubr.bf16.mxu1 %v2654_v0  ;;  %v2410_v0 = vld [vmem:[#allocation10 + $0xd0] ss:$20 sps:$4 sm:$0xff]  }
 0x145   :  { %1354 = vmatpush1.bf16.msra.mxu0 %v2395_v22  ;;  %1395 = vmatpush1.bf16.msra.mxu1 %v2398_v24  ;;  %v2443_v24 = vld [vmem:[#allocation10 + $0x128] ss:$20 sps:$4 sm:$0xff]  }
 0x146   :  { %1355 = vmatprep.subr.bf16.mxu0 %v2403_v26  ;;  %1396 = vmatprep.subr.bf16.mxu1 %v2406_v27  ;;  %v2452_v26 = vld [vmem:[#allocation11 + $0x38] sm:$0xff]   ;;  %v2455_v27 = vld [vmem:[#allocation11 + $0x70] sm:$0xff]  }
 0x149   :  { %1356 = vmatpush1.bf16.msra.mxu0 %v2401_v28  ;;  %1397 = vmatpush1.bf16.msra.mxu1 %v2404_v29  ;;  %v2444_v28 = vld [vmem:[#allocation10 + $0x100] ss:$20 sps:$4 sm:$0xff]  }
 0x14a   :  { %1357 = vmatprep.subr.bf16.mxu0 %v2409_v30  ;;  %1398 = vmatprep.subr.bf16.mxu1 %v2412_v31  ;;  %v2456_v29 = vld [vmem:[#allocation11 + $0x30] sm:$0xff]   ;;  %v2459_v30 = vld [vmem:[#allocation11 + $0x68] sm:$0xff]  }
 0x14b   :  { %v2445_v31 = vld [vmem:[#allocation10 + $0xd8] ss:$20 sps:$4 sm:$0xff]  }
 0x14d   :  { %1358 = vmatpush1.bf16.msra.mxu0 %v2407_v32  ;;  %1399 = vmatpush1.bf16.msra.mxu1 %v2410_v0  ;;  %v2460_v32 = vld [vmem:[#allocation11 + $0x28] sm:$0xff]   ;;  %v2463_v0 = vld [vmem:[#allocation11 + $0x60] sm:$0xff]  }
 0x14e   :  { %1359 = vmatprep.subr.bf16.mxu0 %v2415_v33  ;;  %1400 = vmatprep.subr.bf16.mxu1 %v2418_v34  ;;  %v2446_v33 = vld [vmem:[#allocation10 + $0xb0] ss:$20 sps:$4 sm:$0xff]  }
 0x14f   :  { %v2464_v34 = vld [vmem:[#allocation11 + $0x20] sm:$0xff]  }
 0x151   :  { %1360 = vmatpush1.bf16.msra.mxu0 %v2413_v35  ;;  %1401 = vmatpush1.bf16.msra.mxu1 %v2416_v36  ;;  %v2467_v35 = vld [vmem:[#allocation11 + $0x58] sm:$0xff]  }
 0x152   :  { %1361 = vmatprep.subr.bf16.mxu0 %v2421_v37  ;;  %1402 = vmatprep.subr.bf16.mxu1 %v2424_v38  ;;  %v2447_v36 = vld [vmem:[#allocation10 + $0x88] ss:$20 sps:$4 sm:$0xff]   ;;  %v2471_v38 = vld [vmem:[#allocation11 + $0x50] sm:$0xff]  }
 0x153   :  { %v2468_v37 = vld [vmem:[#allocation11 + $0x18] sm:$0xff]  }
 0x155   :  { %1362 = vmatpush1.bf16.msra.mxu0 %v2419_v39  ;;  %1403 = vmatpush1.bf16.msra.mxu1 %v2422_v40  ;;  %v2448_v39 = vld [vmem:[#allocation10 + $0x60] ss:$20 sps:$4 sm:$0xff]  }
 0x156   :  { %1363 = vmatprep.subr.bf16.mxu0 %v2427_v41  ;;  %1404 = vmatprep.subr.bf16.mxu1 %v2430_v42  ;;  %v2472_v40 = vld [vmem:[#allocation11 + $0x10] sm:$0xff]   ;;  %v2449_v41 = vld [vmem:[#allocation10 + $0x38] ss:$20 sps:$4 sm:$0xff]  }
 0x157   :  { %v2450_v42 = vld [vmem:[#allocation10 + $0x10] ss:$20 sps:$4 sm:$0xff]  }
 0x159   :  { %1364 = vmatpush1.bf16.msra.mxu0 %v2425_v43  ;;  %1405 = vmatpush1.bf16.msra.mxu1 %v2428_v44  ;;  %v2453_v43 = vld [vmem:[#allocation11 + $0xf8] sm:$0xff]  }
 0x15a   :  { %1365 = vmatprep.subr.bf16.mxu0 %v2433_v45  ;;  %1406 = vmatprep.subr.bf16.mxu1 %v2436_v47  ;;  %v2454_v44 = vld [vmem:[#allocation11 + $0xb8] sm:$0xff]   ;;  %v2457_v45 = vld [vmem:[#allocation11 + $0xf0] sm:$0xff]   ;;  %v2461_v47 = vld [vmem:[#allocation11 + $0xe8] sm:$0xff]  }
 0x15d   :  { %1366 = vmatpush1.bf16.msra.mxu0 %v2431_v46  ;;  %1407 = vmatpush1.bf16.msra.mxu1 %v2434_v48  ;;  %v2458_v46 = vld [vmem:[#allocation11 + $0xb0] sm:$0xff]   ;;  %v2462_v48 = vld [vmem:[#allocation11 + $0xa8] sm:$0xff]  }
 0x15e   :  { %1367 = vmatprep.subr.bf16.mxu0 %v2439_v49  ;;  %1408 = vmatprep.subr.bf16.mxu1 %v2442_v51  ;;  %v2465_v49 = vld [vmem:[#allocation11 + $0xe0] sm:$0xff]   ;;  %v2469_v51 = vld [vmem:[#allocation11 + $0xd8] sm:$0xff]  }
 0x161   :  { %1368 = vmatpush1.bf16.msra.mxu0 %v2437_v50  ;;  %1409 = vmatpush1.bf16.msra.mxu1 %v2440_v52  ;;  %v2466_v50 = vld [vmem:[#allocation11 + $0xa0] sm:$0xff]   ;;  %v2470_v52 = vld [vmem:[#allocation11 + $0x98] sm:$0xff]  }
 0x162   :  { %2274 = vmatprep.subr.bf16.mxu0 %v2655_v60  ;;  %2221 = vmatprep.subr.bf16.mxu1 %v2451_v61  ;;  %v2473_v61 = vld [vmem:[#allocation11 + $0xd0] sm:$0xff]  }
 0x1e3   :  { %v2140_v62 = vpop.f32.mrf.mxu0  ;;  %v2162_v63 = vpop.f32.mrf.mxu1 }
 0x1e5   :  { %v2141_v2 = vpop.f32.mrf.mxu0  ;;  %v2163_v3 = vpop.f32.mrf.mxu1 }
 0x1e6   :  { %v2142_v8 = vadd.f32 %v2141_v2, %v2140_v62  ;;  %v2164_v12 = vadd.f32 %v2163_v3, %v2162_v63  ;;  %v2474_v62 = vld [vmem:[#allocation11 + $0x90] sm:$0xff]   ;;  %v2475_v63 = vld [vmem:[#allocation11 + $0x48] sm:$0xff]  }
 0x1e7   :  { %v2143_v4 = vpop.f32.mrf.mxu0  ;;  %v2165_v5 = vpop.f32.mrf.mxu1  ;;  %v2476_v2 = vld [vmem:[#allocation11 + $0x8] sm:$0xff]  }
 0x1e8   :  { %v944_v10 = vadd.f32 %v2142_v8, %v1978_v9  ;;  %v2477_v3 = vld [vmem:[#allocation11 + $0xc8] sm:$0xff]   ;;  %v2479_v5 = vld [vmem:[#allocation11 + $0x40] sm:$0xff]   ;;  %v1118_v9 = vld [vmem:[%s2832_s6] sm:$0x1f] }
 0x1e9   :  { %v2144_v6 = vpop.f32.mrf.mxu0  ;;  %v2166_v7 = vpop.f32.mrf.mxu1  ;;  %v2478_v4 = vld [vmem:[#allocation11 + $0x88] sm:$0xff]   ;;  %v2482_v8 = vld [vmem:[#allocation11 + $0x80] sm:$0xff]  }
 0x1ea   :  { %v984_v15 = vadd.f32 %v2164_v12, %v944_v10  ;;  %v2480_v6 = vld [vmem:[#allocation11] sm:$0xff]   ;;  %v1123_v10 = vrot.slane %v1118_v9, %v128_v55  ;;  %v1127_v12 = vrot.slane %v1118_v9, %v132_v58 }
 0x1eb   :  { %v2481_v7 = vld [vmem:[#allocation11 + $0xc0] sm:$0xff]  }
 0x203   :  { %v2184_v11 = vpop.f32.mrf.mxu0  ;;  %v2206_v13 = vpop.f32.mrf.mxu1 }
 0x205   :  { %v2185_v14 = vpop.f32.mrf.mxu0  ;;  %v2207_v17 = vpop.f32.mrf.mxu1 }
 0x206   :  { %v2186_v16 = vadd.f32 %v2185_v14, %v2184_v11  ;;  %v2208_v19 = vadd.f32 %v2207_v17, %v2206_v13  ;;  %v1131_v11 = vrot.slane %v1118_v9, %v136_v57  ;;  %v1135_v13 = vrot.slane %v1118_v9, %v140_v59 }
 0x207   :  { %v2187_v56 = vpop.f32.mrf.mxu0  ;;  %v2209_v20 = vpop.f32.mrf.mxu1 }
 0x208   :  { %v1024_v18 = vadd.f32 %v2186_v16, %v984_v15 }
 0x209   :  { %v2188_v21 = vpop.f32.mrf.mxu0  ;;  %v2210_v23 = vpop.f32.mrf.mxu1 }
 0x20a   :  { %v1064_v22 = vadd.f32 %v2208_v19, %v1024_v18 }
 0x20c   :  { %v1069_v25 = vpack.c.bf16 %v1064_v22, %v1064_v22 }
 0x20e   :  { %1386 = vmatmul.mubr.bf16.vlgmr.msra.gmra.mxu0 %v1069_v25  ;;  %1427 = vmatmul.mubr.bf16.vlgmr.msra.gmra.mxu1 %v1069_v25 }
 0x20f   :  { %2275 = vmatpush3.bf16.msra.mxu0 %v2443_v24  ;;  %2290 = vmatprep.mubr.msk.bf16.mxu0 %vm2656_vm1, %v2655_v60 }
 0x210   :  { %2276 = vmatprep.subr.bf16.mxu0 %v2655_v60  ;;  %2222 = vmatpush3.bf16.msra.mxu1 %v2452_v26 }
 0x211   :  { %2223 = vmatprep.subr.bf16.mxu1 %v2455_v27 }
 0x213   :  { %2277 = vmatpush3.bf16.msra.mxu0 %v2444_v28  ;;  %v2483_v28 = vld [vmem:[#allocation11 + $0x138] sm:$0xff]  }
 0x214   :  { %2278 = vmatprep.subr.bf16.mxu0 %v2655_v60  ;;  %2224 = vmatpush3.bf16.msra.mxu1 %v2456_v29 }
 0x215   :  { %2225 = vmatprep.subr.bf16.mxu1 %v2459_v30  ;;  %v2484_v30 = vld [vmem:[#allocation11 + $0x130] sm:$0xff]  }
 0x217   :  { %2279 = vmatpush3.bf16.msra.mxu0 %v2445_v31  ;;  %v2485_v31 = vld [vmem:[#allocation11 + $0x128] sm:$0xff]  }
 0x218   :  { %2280 = vmatprep.subr.bf16.mxu0 %v2655_v60  ;;  %2226 = vmatpush3.bf16.msra.mxu1 %v2460_v32  ;;  %v2486_v32 = vld [vmem:[#allocation11 + $0x120] sm:$0xff]  }
 0x219   :  { %2227 = vmatprep.subr.bf16.mxu1 %v2463_v0  ;;  %v2487_v0 = vld [vmem:[#allocation11 + $0x118] sm:$0xff]  }
 0x21b   :  { %2281 = vmatpush3.bf16.msra.mxu0 %v2446_v33  ;;  %v2488_v33 = vld [vmem:[#allocation11 + $0x110] sm:$0xff]  }
 0x21c   :  { %2282 = vmatprep.subr.bf16.mxu0 %v2655_v60  ;;  %2228 = vmatpush3.bf16.msra.mxu1 %v2464_v34  ;;  %v1139_v34 = vrot.slane %v1118_v9, %v144_v1 }
 0x21d   :  { %2229 = vmatprep.subr.bf16.mxu1 %v2467_v35  ;;  %v2489_v35 = vld [vmem:[#allocation11 + $0x108] sm:$0xff]  }
 0x21f   :  { %2283 = vmatpush3.bf16.msra.mxu0 %v2447_v36 }
 0x220   :  { %2284 = vmatprep.subr.bf16.mxu0 %v2655_v60  ;;  %2230 = vmatpush3.bf16.msra.mxu1 %v2468_v37 }
 0x221   :  { %2231 = vmatprep.subr.bf16.mxu1 %v2471_v38 }
 0x223   :  { %2285 = vmatpush3.bf16.msra.mxu0 %v2448_v39  ;;  %v2490_v39 = vld [vmem:[#allocation11 + $0x100] sm:$0xff]  }
 0x224   :  { %2286 = vmatprep.subr.bf16.mxu0 %v2655_v60  ;;  %2232 = vmatpush3.bf16.msra.mxu1 %v2472_v40 }
 0x225   :  { %2233 = vmatprep.subr.bf16.mxu1 %v2475_v63 }
 0x227   :  { %2287 = vmatpush3.bf16.msra.mxu0 %v2449_v41 }
 0x228   :  { %2288 = vmatprep.subr.bf16.mxu0 %v2655_v60  ;;  %2234 = vmatpush3.bf16.msra.mxu1 %v2476_v2 }
 0x229   :  { %2235 = vmatprep.subr.bf16.mxu1 %v2479_v5 }
 0x22b   :  { %2289 = vmatpush3.bf16.msra.mxu0 %v2450_v42 }
 0x22c   :  { %2243 = vmatprep.subr.bf16.mxu0 %v2453_v43  ;;  %2236 = vmatpush3.bf16.msra.mxu1 %v2480_v6 }
 0x22d   :  { %2294 = vmatprep.subr.bf16.mxu1 %v2655_v60 }
 0x22e   :  { %2291 = vmatmul.mubr.bf16.vlgmr.msra.gmra.mxu0 %v1069_v25 }
 0x22f   :  { %2244 = vmatpush3.bf16.msra.mxu0 %v2454_v44 }
 0x230   :  { %2245 = vmatprep.subr.bf16.mxu0 %v2457_v45 }
 0x233   :  { %2246 = vmatpush3.bf16.msra.mxu0 %v2458_v46 }
 0x234   :  { %2247 = vmatprep.subr.bf16.mxu0 %v2461_v47 }
 0x237   :  { %2248 = vmatpush3.bf16.msra.mxu0 %v2462_v48 }
 0x238   :  { %2249 = vmatprep.subr.bf16.mxu0 %v2465_v49 }
 0x23b   :  { %2250 = vmatpush3.bf16.msra.mxu0 %v2466_v50 }
 0x23c   :  { %2251 = vmatprep.subr.bf16.mxu0 %v2469_v51  ;;  %v2083_v51 = vld [vmem:[%s2834_s8] ss:$0 sm:$0xff] }
 0x23f   :  { %2252 = vmatpush3.bf16.msra.mxu0 %v2470_v52 }
 0x240   :  { %2253 = vmatprep.subr.bf16.mxu0 %v2473_v61 }
 0x243   :  { %2254 = vmatpush3.bf16.msra.mxu0 %v2474_v62 }
 0x244   :  { %2255 = vmatprep.subr.bf16.mxu0 %v2477_v3 }
 0x247   :  { %2256 = vmatpush3.bf16.msra.mxu0 %v2478_v4 }
 0x248   :  { %2257 = vmatprep.subr.bf16.mxu0 %v2481_v7 }
 0x24b   :  { %2258 = vmatpush3.bf16.msra.mxu0 %v2482_v8 }
 0x2ce   :  { %v1387_v14 = vpop.f32.mrf.mxu0  ;;  %v1428_v15 = vpop.f32.mrf.mxu1 }
 0x2cf   :  { %v1388_v16 = vadd.f32 %v1387_v14, %v1123_v10  ;;  %v1429_v17 = vadd.f32 %v1428_v15, %v1131_v11 }
 0x2d0   :  { %v1389_v56 = vpop.f32.mrf.mxu0  ;;  %v1430_v18 = vpop.f32.mrf.mxu1 }
 0x2d1   :  { %v1390_v19 = vadd.f32 %v1389_v56, %v1127_v12  ;;  %v1431_v20 = vadd.f32 %v1430_v18, %v1135_v13  ;;  %v1475_v21 = vmax.f32 %v1388_v16, 0.0  ;;  %v1477_v22 = vmax.f32 %v1429_v17, 0.0 }
 0x2d2   :  { %v1391_v55 = vpop.f32.mrf.mxu0  ;;  %v1432_v23 = vpop.f32.mrf.mxu1 }
 0x2d3   :  { %v1476_v24 = vmax.f32 %v1390_v19, 0.0  ;;  %v1478_v57 = vmax.f32 %v1431_v20, 0.0  ;;  %v1480_v59 = vpack.c.bf16 %v1475_v21, %v1475_v21  ;;  %v1482_v29 = vpack.c.bf16 %v1477_v22, %v1477_v22 }
 0x2d4   :  { %v1392_v25 = vpop.f32.mrf.mxu0  ;;  %v1433_v26 = vpop.f32.mrf.mxu1 }
 0x2d5   :  { %v1481_v58 = vpack.c.bf16 %v1476_v24, %v1476_v24  ;;  %v1483_v27 = vpack.c.bf16 %v1478_v57, %v1478_v57 }
 0x2d7   :  { %1844 = vmatprep.mubr.bf16.mxu1 %v1481_v58  ;;  %1884 = vmatprep.mubr.bf16.mxu0 %v1483_v27 }
 0x2d8   :  { %1845 = vmatmul.mubr.bf16.vlgmr.msra.gmra.mxu1 %v1480_v59  ;;  %1885 = vmatmul.mubr.bf16.vlgmr.msra.gmra.mxu0 %v1482_v29 }
 0x2d9   :  { %2295 = vmatpush3.bf16.msra.mxu1 %v2483_v28  ;;  %2310 = vmatprep.mubr.msk.bf16.mxu1 %vm2656_vm1, %v2655_v60 }
 0x2da   :  { %2296 = vmatprep.subr.bf16.mxu1 %v2655_v60 }
 0x2dd   :  { %2297 = vmatpush3.bf16.msra.mxu1 %v2484_v30 }
 0x2de   :  { %2298 = vmatprep.subr.bf16.mxu1 %v2655_v60 }
 0x2e1   :  { %2299 = vmatpush3.bf16.msra.mxu1 %v2485_v31 }
 0x2e2   :  { %2300 = vmatprep.subr.bf16.mxu1 %v2655_v60 }
 0x2e5   :  { %2301 = vmatpush3.bf16.msra.mxu1 %v2486_v32 }
 0x2e6   :  { %2302 = vmatprep.subr.bf16.mxu1 %v2655_v60 }
 0x2e9   :  { %2303 = vmatpush3.bf16.msra.mxu1 %v2487_v0 }
 0x2ea   :  { %2304 = vmatprep.subr.bf16.mxu1 %v2655_v60 }
 0x2ed   :  { %2305 = vmatpush3.bf16.msra.mxu1 %v2488_v33 }
 0x2ee   :  { %v1469_v36 = vpop.f32.mrf.mxu0  ;;  %2306 = vmatprep.subr.bf16.mxu1 %v2655_v60 }
 0x2ef   :  { %v1470_v37 = vadd.f32 %v1469_v36, %v1139_v34 }
 0x2f0   :  { %v2292_v38 = vpop.f32.mrf.mxu0 }
 0x2f1   :  { %2307 = vmatpush3.bf16.msra.mxu1 %v2489_v35  ;;  %v1479_v40 = vmax.f32 %v1470_v37, 0.0 }
 0x2f2   :  { %v1472_v41 = vpop.f32.mrf.mxu0  ;;  %2308 = vmatprep.subr.bf16.mxu1 %v2655_v60  ;;  %v1933_v60 = vand.u32 127, %v126_v53 }
 0x2f3   :  { %v1484_v43 = vpack.c.bf16 %v1479_v40, %v1479_v40 }
 0x2f4   :  { %v2293_v42 = vpop.f32.mrf.mxu0  ;;  %vm1934_vm2 = vcmp.lt.s32.totalorder %v1933_v60, 6  ;;  %vm1939_vm3 = vcmp.eq.s32.totalorder %v1933_v60, 6 }
 0x2f5   :  { %2309 = vmatpush3.bf16.msra.mxu1 %v2490_v39 }
 0x2f8   :  { %2311 = vmatmul.mubr.bf16.vlgmr.msra.gmra.mxu1 %v1484_v43 }
 0x398   :  { %v2237_v44 = vpop.f32.mrf.mxu1  ;;  %v2259_v54 = vpop.f32.mrf.mxu0 }
 0x39a   :  { %v2238_v1 = vpop.f32.mrf.mxu1  ;;  %v2260_v45 = vpop.f32.mrf.mxu0 }
 0x39b   :  { %v2239_v50 = vadd.f32 %v2238_v1, %v2237_v44  ;;  %v2261_v61 = vadd.f32 %v2260_v45, %v2259_v54 }
 0x39c   :  { %v2240_v46 = vpop.f32.mrf.mxu1  ;;  %v2262_v47 = vpop.f32.mrf.mxu0 }
 0x39d   :  { %v1847_v52 = vadd.f32 %v2239_v50, %v2083_v51 }
 0x39e   :  { %v2241_v48 = vpop.f32.mrf.mxu1  ;;  %v2263_v49 = vpop.f32.mrf.mxu0 }
 0x39f   :  { %v1887_v62 = vadd.f32 %v2261_v61, %v1847_v52 }
 0x3b8   :  { %v1926_v63 = vpop.f32.mrf.mxu1 }
 0x3b9   :  { %v1927_v2 = vadd.f32 %v1926_v63, %v1887_v62 }
 0x3ba   :  { %v2312_v3 = vpop.f32.mrf.mxu1 }
 0x3bb   :  { %v1935_v4 = vsel %vm1934_vm2, %v1927_v2, 0.0  ;;  %v1940_v7 = vsel %vm1939_vm3, %v1927_v2, 0.0 }
 0x3bc   :  { %v1929_v5 = vpop.f32.mrf.mxu1  ;;  %1936 = vadd.xlane.f32.xlu0 %v1935_v4 }
 0x3be   :  { %v2313_v6 = vpop.f32.mrf.mxu1 }
 0x3c0   :  { %1941 = vadd.xlane.f32.xlu0 %v1940_v7 }
 0x445   :  { %v1937_v8 = vpop.xlane.xlu0 %1936 }
 0x446   :  { %v1938_v10 = vmul.f32 0.16666667, %v1937_v8 }
 0x449   :  { %v1942_v9 = vpop.xlane.xlu0 %1941 }
 0x44a   :  { %v1943_v11 = vadd.f32 %v1942_v9, %v1927_v2 }
 0x44c   :  { %v1944_v12 = vsub.f32 %v1943_v11, %v1938_v10 }
 0x44e   :  { %1945 = vst [vmem:[#allocation13] sm:$0xff] %v1944_v12 }
 0x44f   :  { %1950 = vsyncadd [#allocation4], 96  ;;  %s2657_s8 = smov [#allocation13]  }
 0x450   :  { %s1951_s24 = sshll.u32 %s2657_s8, 4  ;;  %s1952_s24 = int_to_ptr.vmem [resolvable:$true] %s1951_s24 }
 0x451   :  { %s2611_s25 = scalar_lea.vmem %s1952_s24, 32  ;;  %s2615_s26 = scalar_lea.vmem %s1952_s24, 128 }
 0x452   :  { %p2612_p2 = scmp.ne.s32.totalorder %s1952_s24, %s2611_s25  ;;  %p2616_p3 = scmp.lt.s32.totalorder %s1952_s24, %s1952_s24 }
 0x453   :  { %p2617_p4 = scmp.lt.s32.totalorder %s2615_s26, %s2611_s25 }
 0x455   :  { %p2618_p5 = por %p2617_p4, %p2616_p3 }
 0x457   :  { %p2619_p6 = pnand %p2618_p5, %p2612_p2 }
 0x459   :  { %2622 = shalt.err (!%p2619_p6)
}
 0x45a   :  { %1957 = dma.vmem_to_hbm [thread:$0]  %s1952_s24, 32, %s2835_s9, [#allocation4], %s2643_s13, %s2643_s13, %s2649_s28  }
 0x45b   :  { %2639 = dma.done.wait [#allocation4], 128  }
 0x45c   :  { %2640 = vsyncadd [#allocation4], 4294967168 }
 0x45d   :  { %1961 = vsyncpa [#allocation3], 1 }
 0x45e   :  { %1962 = vsyncpa [#allocation6], 1 }
 0x45f   :  { %1963 = vsyncpa [#allocation9], 1 }
 0x460   :  { %1964 = vsyncpa [#allocation12], 1 }
 0x461   :  { %1965 = vsyncpa [#allocation4], 1 }

// kernel: tpu_custom_call.1
= control target key start
LH: loop header
LB: loop body
LE: loop exit
PB: predicated region body
PF: predicated region fallthrough
CT: control target
= control target key end

     0   :  { %14 = vsyncpa [#allocation3], 0  ;;  %s2826_s0 = inlined_call_operand.hbm [shape: f32[2,16], index: 0, kind: input, shape index: {}]   ;;  %s2827_s1 = inlined_call_operand.hbm [shape: bf16[16,1024], index: 1, kind: input, shape index: {}]   ;;  %s2828_s2 = inlined_call_operand.hbm [shape: f32[1,1024], index: 2, kind: input, shape index: {}]   ;;  %s2829_s3 = inlined_call_operand.hbm [shape: bf16[1024,128], index: 3, kind: input, shape index: {}]   ;;  %s2830_s4 = inlined_call_operand.vmem [shape: f32[1,128], index: 4, kind: input, shape index: {}]   ;;  %s2831_s5 = inlined_call_operand.hbm [shape: bf16[128,640], index: 5, kind: input, shape index: {}]   ;;  %s2832_s6 = inlined_call_operand.vmem [shape: f32[1,640], index: 6, kind: input, shape index: {}]   ;;  %s2833_s7 = inlined_call_operand.hbm [shape: bf16[640,128], index: 7, kind: input, shape index: {}]   ;;  %s2834_s8 = inlined_call_operand.vmem [shape: f32[1,128], index: 8, kind: input, shape index: {}]   ;;  %s2835_s9 = inlined_call_operand.hbm [shape: f32[2,128], index: 9, kind: output, shape index: {}]  }
   0x1   :  { %15 = vsyncpa [#allocation6], 0 }
   0x2   :  { %16 = vsyncpa [#allocation9], 0 }
   0x3   :  { %17 = vsyncpa [#allocation12], 0 }
   0x4   :  { %18 = vsyncpa [#allocation4], 0 }
   0x5   :  { %23 = vsyncadd [#allocation3], 96  ;;  %s2641_s30 = smov [#allocation5]  }
   0x6   :  { %s36_s10 = sshll.u32 %s2641_s30, 4  ;;  %s37_s10 = int_to_ptr.vmem [resolvable:$true] %s36_s10 }
   0x7   :  { %s2499_s11 = scalar_lea.vmem %s37_s10, 1024  ;;  %p2504_p1 = scmp.lt.s32.totalorder %s37_s10, %s37_s10 }
   0x8   :  { %p2500_p0 = scmp.ne.s32.totalorder %s37_s10, %s2499_s11  ;;  %p2505_p2 = scmp.lt.s32.totalorder %s2499_s11, %s2499_s11 }
   0xa   :  { %p2506_p3 = por %p2505_p2, %p2504_p1 }
   0xc   :  { %p2507_p4 = pnand %p2506_p3, %p2500_p0 }
   0xe   :  { %2510 = shalt.err (!%p2507_p4)
}
   0xf   :  { %s2642_s12 = smov 512   ;;  %s2643_s13 = smov 32  }
  0x10   :  { %42 = dma.hbm_to_vmem [thread:$0]  %s2827_s1, 1024, %s37_s10, [#allocation6], %s2642_s12, %s2642_s12, %s2643_s13  }
  0x11   :  { %s2644_s16 = smov [#allocation8]  }
  0x12   :  { %s58_s17 = sshll.u32 %s2644_s16, 4  ;;  %s59_s17 = int_to_ptr.vmem [resolvable:$true] %s58_s17 }
  0x13   :  { %s2519_s18 = scalar_lea.vmem %s59_s17, 8192  ;;  %p2524_p6 = scmp.lt.s32.totalorder %s59_s17, %s59_s17 }
  0x14   :  { %p2520_p5 = scmp.ne.s32.totalorder %s59_s17, %s2519_s18  ;;  %p2525_p7 = scmp.lt.s32.totalorder %s2519_s18, %s2519_s18 }
  0x16   :  { %p2526_p8 = por %p2525_p7, %p2524_p6 }
  0x18   :  { %p2527_p9 = pnand %p2526_p8, %p2520_p5 }
  0x1a   :  { %2530 = shalt.err (!%p2527_p9)
}
  0x1b   :  { %s2645_s19 = smov 64   ;;  %s2646_s20 = smov 4  }
  0x1c   :  { %64 = dma.hbm_to_vmem [thread:$0]  %s2829_s3, 8192, %s59_s17, [#allocation9], %s2645_s19, %s2645_s19, %s2646_s20  }
  0x1d   :  { %s2647_s1 = smov [#allocation2]   ;;  %s2648_s24 = smov [#allocation7]  }
  0x1e   :  { %s24_s23 = sshll.u32 %s2647_s1, 4  ;;  %s49_s25 = sshll.u32 %s2648_s24, 4  ;;  %s25_s23 = int_to_ptr.vmem [resolvable:$true] %s24_s23  ;;  %s50_s25 = int_to_ptr.vmem [resolvable:$true] %s49_s25 }
  0x1f   :  { %s2539_s26 = scalar_lea.vmem %s25_s23, 32  ;;  %s2543_s27 = scalar_lea.vmem %s25_s23, 128 }
  0x20   :  { %p2540_p10 = scmp.ne.s32.totalorder %s25_s23, %s2539_s26  ;;  %p2544_p11 = scmp.lt.s32.totalorder %s25_s23, %s25_s23 }
  0x21   :  { %p2545_p12 = scmp.lt.s32.totalorder %s2543_s27, %s2539_s26 }
  0x23   :  { %p2546_p13 = por %p2545_p12, %p2544_p11 }
  0x25   :  { %p2547_p0 = pnand %p2546_p13, %p2540_p10 }
  0x27   :  { %2550 = shalt.err (!%p2547_p0)
}
  0x28   :  { %s2649_s28 = smov 2   ;;  %s2559_s3 = scalar_lea.vmem %s50_s25, 128 }
  0x29   :  { %30 = dma.hbm_to_vmem [thread:$0]  %s2826_s0, 32, %s25_s23, [#allocation3], %s2643_s13, %s2643_s13, %s2649_s28  }
  0x2a   :  { %p2560_p1 = scmp.ne.s32.totalorder %s50_s25, %s2559_s3  ;;  %p2564_p2 = scmp.lt.s32.totalorder %s50_s25, %s50_s25 }
  0x2b   :  { %p2565_p3 = scmp.lt.s32.totalorder %s2559_s3, %s2559_s3 }
  0x2d   :  { %p2566_p4 = por %p2565_p3, %p2564_p2 }
  0x2f   :  { %p2567_p5 = pnand %p2566_p4, %p2560_p1 }
  0x31   :  { %2570 = shalt.err (!%p2567_p5)
}
  0x32   :  { %52 = dma.hbm_to_vmem [thread:$0]  %s2828_s2, 128, %s50_s25, [#allocation6]  }
  0x33   :  { %s2650_s12 = smov [#allocation10]  }
  0x34   :  { %s72_s14 = sshll.u32 %s2650_s12, 4  ;;  %s73_s14 = int_to_ptr.vmem [resolvable:$true] %s72_s14 }
  0x35   :  { %s2579_s15 = scalar_lea.vmem %s73_s14, 5120  ;;  %p2584_p7 = scmp.lt.s32.totalorder %s73_s14, %s73_s14 }
  0x36   :  { %p2580_p6 = scmp.ne.s32.totalorder %s73_s14, %s2579_s15  ;;  %p2585_p8 = scmp.lt.s32.totalorder %s2579_s15, %s2579_s15 }
  0x38   :  { %p2586_p9 = por %p2585_p8, %p2584_p7 }
  0x3a   :  { %p2587_p10 = pnand %p2586_p9, %p2580_p6 }
  0x3c   :  { %2590 = shalt.err (!%p2587_p10)
}
  0x3d   :  { %s2651_s0 = smov 320   ;;  %s2652_s16 = smov 20  }
  0x3e   :  { %78 = dma.hbm_to_vmem [thread:$0]  %s2831_s5, 5120, %s73_s14, [#allocation9], %s2651_s0, %s2651_s0, %s2652_s16  }
  0x3f   :  { %s2653_s21 = smov [#allocation11]  }
  0x40   :  { %s86_s22 = sshll.u32 %s2653_s21, 4  ;;  %s87_s22 = int_to_ptr.vmem [resolvable:$true] %s86_s22 }
  0x41   :  { %s2599_s2 = scalar_lea.vmem %s87_s22, 5120  ;;  %p2604_p12 = scmp.lt.s32.totalorder %s87_s22, %s87_s22 }
  0x42   :  { %p2600_p11 = scmp.ne.s32.totalorder %s87_s22, %s2599_s2  ;;  %p2605_p13 = scmp.lt.s32.totalorder %s2599_s2, %s2599_s2 }
  0x44   :  { %p2606_p0 = por %p2605_p13, %p2604_p12 }
  0x46   :  { %p2607_p1 = pnand %p2606_p0, %p2600_p11 }
  0x48   :  { %2610 = shalt.err (!%p2607_p1)
}
  0x49   :  { %92 = dma.hbm_to_vmem [thread:$0]  %s2833_s7, 5120, %s87_s22, [#allocation12], %s2645_s19, %s2645_s19, %s2646_s20  }
  0x4a   :  { %2631 = dma.done.wait [#allocation3], 128  }
  0x4b   :  { %2632 = vsyncadd [#allocation3], 4294967168 }
  0x4c   :  { %2633 = dma.done.wait [#allocation6], 1152  }
  0x4d   :  { %2634 = vsyncadd [#allocation6], 4294966144 }
  0x4e   :  { %2635 = dma.done.wait [#allocation9], 13312  }
  0x4f   :  { %2636 = vsyncadd [#allocation9], 4294953984 }
  0x50   :  { %2637 = dma.done.wait [#allocation12], 5120  }
  0x51   :  { %2638 = vsyncadd [#allocation12], 4294962176  ;;  %v2654_v0 = vmov 0   ;;  %v116_v1 = vld [vmem:[#allocation5] sm:$0xff]  ;;  %v117_v3 = vld [vmem:[#allocation5 + $0x8] sm:$0xff]  ;;  %vm206_vm0 = vcmask 130048   ;;  %v126_v53 = vlaneseq }
  0x52   :  { %242 = vmatprep.mubr.bf16.mxu0 %v2654_v0  ;;  %283 = vmatprep.mubr.bf16.mxu1 %v2654_v0  ;;  %v120_v2 = vld [vmem:[#allocation5 + $0x20] sm:$0xff]  ;;  %v121_v5 = vld [vmem:[#allocation5 + $0x28] sm:$0xff]  ;;  %v114_v7 = vld [vmem:[#allocation2] sm:$0xff]  ;;  %vm2656_vm1 = vmmov 0  }
  0x53   :  { %v1967_v4 = vcombine.high %v116_v1, %v120_v2  ;;  %v1966_v6 = vcombine.low %v116_v1, %v120_v2  ;;  %v118_v8 = vld [vmem:[#allocation5 + $0x10] sm:$0xff]  ;;  %v1969_v9 = vcombine.high %v117_v3, %v121_v5  ;;  %v1968_v10 = vcombine.low %v117_v3, %v121_v5  ;;  %v119_v12 = vld [vmem:[#allocation5 + $0x18] sm:$0xff]  ;;  %v2331_v19 = vld [vmem:[#allocation8 + $0x78] sm:$0xff]  }
  0x54   :  { %v122_v11 = vld [vmem:[#allocation5 + $0x30] sm:$0xff]  ;;  %v123_v13 = vld [vmem:[#allocation5 + $0x38] sm:$0xff]  ;;  %v115_v14 = vpack.c.bf16 %v114_v7, %v114_v7  ;;  %v2332_v20 = vld [vmem:[#allocation8 + $0xf8] sm:$0xff]   ;;  %v2745_v54 = vshrl.u32 %v126_v53, 7 }
  0x55   :  { %224 = vmatprep.subr.bf16.mxu0 %v1967_v4  ;;  %v1971_v15 = vcombine.high %v118_v8, %v122_v11  ;;  %v1973_v16 = vcombine.high %v119_v12, %v123_v13  ;;  %265 = vmatprep.subr.bf16.mxu1 %v1969_v9  ;;  %v1970_v17 = vcombine.low %v118_v8, %v122_v11  ;;  %v2333_v21 = vld [vmem:[#allocation8 + $0x38] sm:$0xff]   ;;  %v2335_v23 = vld [vmem:[#allocation8 + $0x70] sm:$0xff]   ;;  %v2339_v27 = vld [vmem:[#allocation8 + $0x68] sm:$0xff]  }
  0x56   :  { %225 = vmatpush1.bf16.msra.mxu0 %v1966_v6  ;;  %266 = vmatpush1.bf16.msra.mxu1 %v1968_v10  ;;  %v1972_v18 = vcombine.low %v119_v12, %v123_v13  ;;  %v2334_v22 = vld [vmem:[#allocation8 + $0xb8] sm:$0xff]   ;;  %v2336_v24 = vld [vmem:[#allocation8 + $0xf0] sm:$0xff]   ;;  %v2340_v28 = vld [vmem:[#allocation8 + $0xe8] sm:$0xff]   ;;  %v128_v55 = vsub.s32 0, %v2745_v54  ;;  %v136_v57 = vsub.s32 2, %v2745_v54  ;;  %v132_v58 = vsub.s32 1, %v2745_v54 }
  0x57   :  { %306 = vmatprep.subr.bf16.mxu0 %v1971_v15  ;;  %347 = vmatprep.subr.bf16.mxu1 %v1973_v16  ;;  %v2337_v25 = vld [vmem:[#allocation8 + $0x30] sm:$0xff]   ;;  %v2341_v29 = vld [vmem:[#allocation8 + $0x28] sm:$0xff]   ;;  %v2343_v31 = vld [vmem:[#allocation8 + $0x60] sm:$0xff]   ;;  %v140_v59 = vsub.s32 3, %v2745_v54  ;;  %v148_v8 = vsub.s32 5, %v2745_v54  ;;  %v156_v13 = vsub.s32 7, %v2745_v54 }
  0x58   :  { %v2338_v26 = vld [vmem:[#allocation8 + $0xb0] sm:$0xff]   ;;  %v2342_v30 = vld [vmem:[#allocation8 + $0xa8] sm:$0xff]   ;;  %v2344_v32 = vld [vmem:[#allocation8 + $0xe0] sm:$0xff]  }
  0x59   :  { %1974 = vmatmul.mubr.msk.bf16.vlgmr.msra.gmra.mxu0 %vm206_vm0, %v115_v14  ;;  %1975 = vmatmul.mubr.msk.bf16.vlgmr.msra.gmra.mxu1 %vm206_vm0, %v115_v14  ;;  %v2345_v33 = vld [vmem:[#allocation8 + $0x20] sm:$0xff]   ;;  %v2347_v35 = vld [vmem:[#allocation8 + $0x58] sm:$0xff]   ;;  %v2351_v39 = vld [vmem:[#allocation8 + $0x50] sm:$0xff]  }
  0x5a   :  { %307 = vmatpush1.bf16.msra.mxu0 %v1970_v17  ;;  %324 = vmatprep.mubr.bf16.mxu0 %v2654_v0  ;;  %v2346_v34 = vld [vmem:[#allocation8 + $0xa0] sm:$0xff]   ;;  %v2348_v36 = vld [vmem:[#allocation8 + $0xd8] sm:$0xff]   ;;  %v2352_v40 = vld [vmem:[#allocation8 + $0xd0] sm:$0xff]  }
  0x5b   :  { %348 = vmatpush1.bf16.msra.mxu1 %v1972_v18  ;;  %365 = vmatprep.mubr.bf16.mxu1 %v2654_v0  ;;  %v2349_v37 = vld [vmem:[#allocation8 + $0x18] sm:$0xff]   ;;  %v2353_v41 = vld [vmem:[#allocation8 + $0x10] sm:$0xff]   ;;  %v2355_v43 = vld [vmem:[#allocation8 + $0x48] sm:$0xff]  }
  0x5c   :  { %2124 = vmatprep.subr.bf16.mxu0 %v2331_v19  ;;  %2146 = vmatprep.subr.bf16.mxu1 %v2332_v20  ;;  %v2350_v38 = vld [vmem:[#allocation8 + $0x98] sm:$0xff]   ;;  %v2354_v42 = vld [vmem:[#allocation8 + $0x90] sm:$0xff]   ;;  %v2356_v44 = vld [vmem:[#allocation8 + $0xc8] sm:$0xff]  }
  0x5d   :  { %v2357_v45 = vld [vmem:[#allocation8 + $0x8] sm:$0xff]   ;;  %v2359_v47 = vld [vmem:[#allocation8 + $0x40] sm:$0xff]   ;;  %v2363_v51 = vld [vmem:[#allocation8 + $0x178] sm:$0xff]  }
  0x5e   :  { %v2358_v46 = vld [vmem:[#allocation8 + $0x88] sm:$0xff]   ;;  %v2360_v48 = vld [vmem:[#allocation8 + $0xc0] sm:$0xff]   ;;  %v2364_v52 = vld [vmem:[#allocation8 + $0x1f8] sm:$0xff]  }
  0x5f   :  { %v2361_v49 = vld [vmem:[#allocation8] sm:$0xff]   ;;  %v2748_v56 = vld [vmem:[#allocation7] sm:$0xff] }
  0x60   :  { %v2362_v50 = vld [vmem:[#allocation8 + $0x80] sm:$0xff]   ;;  %v129_v60 = vrot.slane %v2748_v56, %v128_v55  ;;  %v137_v61 = vrot.slane %v2748_v56, %v136_v57  ;;  %v133_v62 = vrot.slane %v2748_v56, %v132_v58  ;;  %v141_v1 = vrot.slane %v2748_v56, %v140_v59 }
  0x61   :  { %1976 = vmatmul.mubr.msk.bf16.vlgmr.msra.gmra.mxu0 %vm206_vm0, %v115_v14  ;;  %1977 = vmatmul.mubr.msk.bf16.vlgmr.msra.gmra.mxu1 %vm206_vm0, %v115_v14 }
  0x62   :  { %2125 = vmatpush3.bf16.msra.mxu0 %v2333_v21  ;;  %2147 = vmatpush3.bf16.msra.mxu1 %v2334_v22  ;;  %v2365_v21 = vld [vmem:[#allocation8 + $0x138] sm:$0xff]   ;;  %v149_v22 = vrot.slane %v2748_v56, %v148_v8  ;;  %v2386_v8 = vld [vmem:[#allocation8 + $0x190] sm:$0xff]  }
  0x63   :  { %2126 = vmatprep.subr.bf16.mxu0 %v2335_v23  ;;  %2148 = vmatprep.subr.bf16.mxu1 %v2336_v24 }
  0x66   :  { %2127 = vmatpush3.bf16.msra.mxu0 %v2337_v25  ;;  %2149 = vmatpush3.bf16.msra.mxu1 %v2338_v26  ;;  %v2366_v25 = vld [vmem:[#allocation8 + $0x1b8] sm:$0xff]   ;;  %v2367_v26 = vld [vmem:[#allocation8 + $0x170] sm:$0xff]  }
  0x67   :  { %2128 = vmatprep.subr.bf16.mxu0 %v2339_v27  ;;  %2150 = vmatprep.subr.bf16.mxu1 %v2340_v28  ;;  %v157_v28 = vrot.slane %v2748_v56, %v156_v13 }
  0x6a   :  { %2129 = vmatpush3.bf16.msra.mxu0 %v2341_v29  ;;  %2151 = vmatpush3.bf16.msra.mxu1 %v2342_v30  ;;  %v2368_v29 = vld [vmem:[#allocation8 + $0x1f0] sm:$0xff]  }
  0x6b   :  { %2130 = vmatprep.subr.bf16.mxu0 %v2343_v31  ;;  %2152 = vmatprep.subr.bf16.mxu1 %v2344_v32  ;;  %v2369_v32 = vld [vmem:[#allocation8 + $0x130] sm:$0xff]  }
  0x6e   :  { %2131 = vmatpush3.bf16.msra.mxu0 %v2345_v33  ;;  %2153 = vmatpush3.bf16.msra.mxu1 %v2346_v34 }
  0x6f   :  { %2132 = vmatprep.subr.bf16.mxu0 %v2347_v35  ;;  %2154 = vmatprep.subr.bf16.mxu1 %v2348_v36  ;;  %v2370_v35 = vld [vmem:[#allocation8 + $0x1b0] sm:$0xff]   ;;  %v2371_v36 = vld [vmem:[#allocation8 + $0x168] sm:$0xff]  }
  0x72   :  { %2133 = vmatpush3.bf16.msra.mxu0 %v2349_v37  ;;  %2155 = vmatpush3.bf16.msra.mxu1 %v2350_v38 }
  0x73   :  { %2134 = vmatprep.subr.bf16.mxu0 %v2351_v39  ;;  %2156 = vmatprep.subr.bf16.mxu1 %v2352_v40  ;;  %v2372_v39 = vld [vmem:[#allocation8 + $0x1e8] sm:$0xff]  }
  0x76   :  { %2135 = vmatpush3.bf16.msra.mxu0 %v2353_v41  ;;  %2157 = vmatpush3.bf16.msra.mxu1 %v2354_v42 }
  0x77   :  { %2136 = vmatprep.subr.bf16.mxu0 %v2355_v43  ;;  %2158 = vmatprep.subr.bf16.mxu1 %v2356_v44  ;;  %v2373_v44 = vld [vmem:[#allocation8 + $0x128] sm:$0xff]  }
  0x7a   :  { %2137 = vmatpush3.bf16.msra.mxu0 %v2357_v45  ;;  %2159 = vmatpush3.bf16.msra.mxu1 %v2358_v46 }
  0x7b   :  { %2138 = vmatprep.subr.bf16.mxu0 %v2359_v47  ;;  %2160 = vmatprep.subr.bf16.mxu1 %v2360_v48  ;;  %v2374_v47 = vld [vmem:[#allocation8 + $0x1a8] sm:$0xff]   ;;  %v2375_v48 = vld [vmem:[#allocation8 + $0x160] sm:$0xff]  }
  0x7e   :  { %2139 = vmatpush3.bf16.msra.mxu0 %v2361_v49  ;;  %2161 = vmatpush3.bf16.msra.mxu1 %v2362_v50  ;;  %v2376_v50 = vld [vmem:[#allocation8 + $0x1e0] sm:$0xff]  }
  0x7f   :  { %2168 = vmatprep.subr.bf16.mxu0 %v2363_v51  ;;  %2190 = vmatprep.subr.bf16.mxu1 %v2364_v52  ;;  %v2377_v51 = vld [vmem:[#allocation8 + $0x120] sm:$0xff]  }
  0x80   :  { %v2378_v52 = vld [vmem:[#allocation8 + $0x1a0] sm:$0xff]  }
 0x119   :  { %v244_v63 = vpop.f32.mrf.mxu0  ;;  %v285_v3 = vpop.f32.mrf.mxu1 }
 0x11a   :  { %v245_v2 = vadd.f32 %v244_v63, %v129_v60  ;;  %v286_v4 = vadd.f32 %v285_v3, %v137_v61  ;;  %v2379_v60 = vld [vmem:[#allocation8 + $0x158] sm:$0xff]   ;;  %v152_v63 = vsub.s32 6, %v2745_v54  ;;  %v2383_v3 = vld [vmem:[#allocation8 + $0x150] sm:$0xff]  }
 0x11b   :  { %v246_v5 = vpop.f32.mrf.mxu0  ;;  %v287_v7 = vpop.f32.mrf.mxu1  ;;  %v2380_v61 = vld [vmem:[#allocation8 + $0x1d8] sm:$0xff]  }
 0x11c   :  { %v247_v6 = vadd.f32 %v246_v5, %v133_v62  ;;  %v374_v9 = vmax.f32 %v245_v2, 0.0  ;;  %v376_v10 = vmax.f32 %v286_v4, 0.0  ;;  %v288_v11 = vadd.f32 %v287_v7, %v141_v1  ;;  %v2381_v62 = vld [vmem:[#allocation8 + $0x118] sm:$0xff]   ;;  %v2384_v4 = vld [vmem:[#allocation8 + $0x1d0] sm:$0xff]  }
 0x11d   :  { %v248_v12 = vpop.f32.mrf.mxu0  ;;  %v289_v15 = vpop.f32.mrf.mxu1  ;;  %v144_v1 = vsub.s32 4, %v2745_v54  ;;  %v2382_v2 = vld [vmem:[#allocation8 + $0x198] sm:$0xff]   ;;  %v153_v5 = vrot.slane %v2748_v56, %v152_v63 }
 0x11e   :  { %v375_v14 = vmax.f32 %v247_v6, 0.0  ;;  %v377_v16 = vmax.f32 %v288_v11, 0.0  ;;  %v384_v18 = vpack.c.bf16 %v376_v10, %v376_v10  ;;  %v382_v23 = vpack.c.bf16 %v374_v9, %v374_v9  ;;  %v2385_v6 = vld [vmem:[#allocation8 + $0x110] sm:$0xff]   ;;  %v2387_v9 = vld [vmem:[#allocation8 + $0x148] sm:$0xff]   ;;  %v2391_v15 = vld [vmem:[#allocation8 + $0x140] sm:$0xff]  }
 0x11f   :  { %v249_v17 = vpop.f32.mrf.mxu0  ;;  %v290_v20 = vpop.f32.mrf.mxu1  ;;  %v145_v7 = vrot.slane %v2748_v56, %v144_v1  ;;  %v2388_v10 = vld [vmem:[#allocation8 + $0x1c8] sm:$0xff]   ;;  %v2393_v56 = vld [vmem:[#allocation8 + $0x100] sm:$0xff]  }
 0x120   :  { %v383_v19 = vpack.c.bf16 %v375_v14, %v375_v14  ;;  %v385_v24 = vpack.c.bf16 %v377_v16, %v377_v16  ;;  %v2389_v12 = vld [vmem:[#allocation8 + $0x108] sm:$0xff]   ;;  %v2392_v16 = vld [vmem:[#allocation8 + $0x1c0] sm:$0xff]  }
 0x121   :  { %v2768_v27 = vpop.f32.mrf.mxu0  ;;  %v367_v30 = vpop.f32.mrf.mxu1  ;;  %v2390_v14 = vld [vmem:[#allocation8 + $0x188] sm:$0xff]  }
 0x122   :  { %941 = vmatprep.mubr.bf16.mxu0 %v383_v19  ;;  %981 = vmatprep.mubr.bf16.mxu1 %v385_v24  ;;  %v368_v11 = vadd.f32 %v367_v30, %v153_v5  ;;  %v327_v13 = vadd.f32 %v2768_v27, %v145_v7  ;;  %v2394_v19 = vld [vmem:[#allocation8 + $0x180] sm:$0xff]   ;;  %v2406_v27 = vld [vmem:[#allocation10 + $0xfc] ss:$20 sps:$4 sm:$0xff]  }
 0x123   :  { %942 = vmatmul.mubr.bf16.vlgmr.msra.gmra.mxu0 %v382_v23  ;;  %v328_v31 = vpop.f32.mrf.mxu0  ;;  %982 = vmatmul.mubr.bf16.vlgmr.msra.gmra.mxu1 %v384_v18  ;;  %v369_v34 = vpop.f32.mrf.mxu1  ;;  %v2397_v23 = vld [vmem:[#allocation10 + $0x11c] ss:$20 sps:$4 sm:$0xff]   ;;  %v2398_v24 = vld [vmem:[#allocation10 + $0x120] ss:$20 sps:$4 sm:$0xff]  }
 0x124   :  { %2169 = vmatpush3.bf16.msra.mxu0 %v2365_v21  ;;  %v329_v33 = vadd.f32 %v328_v31, %v149_v22  ;;  %2191 = vmatpush3.bf16.msra.mxu1 %v2366_v25  ;;  %v370_v38 = vadd.f32 %v369_v34, %v157_v28  ;;  %v380_v17 = vmax.f32 %v368_v11, 0.0  ;;  %v378_v18 = vmax.f32 %v327_v13, 0.0  ;;  %v2395_v22 = vld [vmem:[#allocation10 + $0x118] ss:$20 sps:$4 sm:$0xff]   ;;  %v2401_v28 = vld [vmem:[#allocation10 + $0xf0] ss:$20 sps:$4 sm:$0xff]  }
 0x125   :  { %2170 = vmatprep.subr.bf16.mxu0 %v2367_v26  ;;  %v330_v37 = vpop.f32.mrf.mxu0  ;;  %2192 = vmatprep.subr.bf16.mxu1 %v2368_v29  ;;  %v371_v41 = vpop.f32.mrf.mxu1  ;;  %v2400_v25 = vld [vmem:[#allocation10 + $0x124] ss:$20 sps:$4 sm:$0xff]   ;;  %v2403_v26 = vld [vmem:[#allocation10 + $0xf4] ss:$20 sps:$4 sm:$0xff]   ;;  %v2409_v30 = vld [vmem:[#allocation10 + $0xcc] ss:$20 sps:$4 sm:$0xff]  }
 0x126   :  { %v379_v40 = vmax.f32 %v329_v33, 0.0  ;;  %v381_v42 = vmax.f32 %v370_v38, 0.0  ;;  %v388_v20 = vpack.c.bf16 %v380_v17, %v380_v17  ;;  %v386_v21 = vpack.c.bf16 %v378_v18, %v378_v18  ;;  %v2404_v29 = vld [vmem:[#allocation10 + $0xf8] ss:$20 sps:$4 sm:$0xff]   ;;  %v2412_v31 = vld [vmem:[#allocation10 + $0xd4] ss:$20 sps:$4 sm:$0xff]  }
 0x127   :  { %v331_v43 = vpop.f32.mrf.mxu0  ;;  %v372_v46 = vpop.f32.mrf.mxu1  ;;  %v2415_v33 = vld [vmem:[#allocation10 + $0xa4] ss:$20 sps:$4 sm:$0xff]   ;;  %v2418_v34 = vld [vmem:[#allocation10 + $0xac] ss:$20 sps:$4 sm:$0xff]   ;;  %v2421_v37 = vld [vmem:[#allocation10 + $0x7c] ss:$20 sps:$4 sm:$0xff]  }
 0x128   :  { %2171 = vmatpush3.bf16.msra.mxu0 %v2369_v32  ;;  %v387_v45 = vpack.c.bf16 %v379_v40, %v379_v40  ;;  %2193 = vmatpush3.bf16.msra.mxu1 %v2370_v35  ;;  %v389_v49 = vpack.c.bf16 %v381_v42, %v381_v42  ;;  %v2407_v32 = vld [vmem:[#allocation10 + $0xc8] ss:$20 sps:$4 sm:$0xff]   ;;  %v2413_v35 = vld [vmem:[#allocation10 + $0xa0] ss:$20 sps:$4 sm:$0xff]   ;;  %v2424_v38 = vld [vmem:[#allocation10 + $0x84] ss:$20 sps:$4 sm:$0xff]  }
 0x129   :  { %2172 = vmatprep.subr.bf16.mxu0 %v2371_v36  ;;  %2194 = vmatprep.subr.bf16.mxu1 %v2372_v39  ;;  %v2416_v36 = vld [vmem:[#allocation10 + $0xa8] ss:$20 sps:$4 sm:$0xff]   ;;  %v2419_v39 = vld [vmem:[#allocation10 + $0x78] ss:$20 sps:$4 sm:$0xff]   ;;  %v2422_v40 = vld [vmem:[#allocation10 + $0x80] ss:$20 sps:$4 sm:$0xff]  }
 0x12a   :  { %1021 = vmatprep.mubr.bf16.mxu0 %v387_v45  ;;  %1061 = vmatprep.mubr.bf16.mxu1 %v389_v49  ;;  %v2427_v41 = vld [vmem:[#allocation10 + $0x54] ss:$20 sps:$4 sm:$0xff]   ;;  %v2430_v42 = vld [vmem:[#allocation10 + $0x5c] ss:$20 sps:$4 sm:$0xff]   ;;  %v2433_v45 = vld [vmem:[#allocation10 + $0x2c] ss:$20 sps:$4 sm:$0xff]  }
 0x12b   :  { %v2425_v43 = vld [vmem:[#allocation10 + $0x50] ss:$20 sps:$4 sm:$0xff]   ;;  %v2431_v46 = vld [vmem:[#allocation10 + $0x28] ss:$20 sps:$4 sm:$0xff]  }
 0x12c   :  { %2173 = vmatpush3.bf16.msra.mxu0 %v2373_v44  ;;  %2195 = vmatpush3.bf16.msra.mxu1 %v2374_v47  ;;  %v2428_v44 = vld [vmem:[#allocation10 + $0x58] ss:$20 sps:$4 sm:$0xff]   ;;  %v2436_v47 = vld [vmem:[#allocation10 + $0x34] ss:$20 sps:$4 sm:$0xff]  }
 0x12d   :  { %2174 = vmatprep.subr.bf16.mxu0 %v2375_v48  ;;  %2196 = vmatprep.subr.bf16.mxu1 %v2376_v50  ;;  %v2434_v48 = vld [vmem:[#allocation10 + $0x30] ss:$20 sps:$4 sm:$0xff]   ;;  %v2437_v50 = vld [vmem:[#allocation10] ss:$20 sps:$4 sm:$0xff]  }
 0x12e   :  { %v2439_v49 = vld [vmem:[#allocation10 + $0x4] ss:$20 sps:$4 sm:$0xff]  }
 0x130   :  { %2175 = vmatpush3.bf16.msra.mxu0 %v2377_v51  ;;  %2197 = vmatpush3.bf16.msra.mxu1 %v2378_v52  ;;  %v2442_v51 = vld [vmem:[#allocation10 + $0xc] ss:$20 sps:$4 sm:$0xff]   ;;  %v2440_v52 = vld [vmem:[#allocation10 + $0x8] ss:$20 sps:$4 sm:$0xff]  }
 0x131   :  { %2176 = vmatprep.subr.bf16.mxu0 %v2379_v60  ;;  %2198 = vmatprep.subr.bf16.mxu1 %v2380_v61  ;;  %v2655_v60 = vmov 0.0   ;;  %v2451_v61 = vld [vmem:[#allocation11 + $0x78] sm:$0xff]  }
 0x134   :  { %2177 = vmatpush3.bf16.msra.mxu0 %v2381_v62  ;;  %2199 = vmatpush3.bf16.msra.mxu1 %v2382_v2 }
 0x135   :  { %2178 = vmatprep.subr.bf16.mxu0 %v2383_v3  ;;  %2200 = vmatprep.subr.bf16.mxu1 %v2384_v4 }
 0x138   :  { %2179 = vmatpush3.bf16.msra.mxu0 %v2385_v6  ;;  %2201 = vmatpush3.bf16.msra.mxu1 %v2386_v8 }
 0x139   :  { %2180 = vmatprep.subr.bf16.mxu0 %v2387_v9  ;;  %2202 = vmatprep.subr.bf16.mxu1 %v2388_v10  ;;  %v1978_v9 = vld [vmem:[%s2830_s4] ss:$0 sm:$0xff] }
 0x13c   :  { %2181 = vmatpush3.bf16.msra.mxu0 %v2389_v12  ;;  %2203 = vmatpush3.bf16.msra.mxu1 %v2390_v14 }
 0x13d   :  { %2182 = vmatprep.subr.bf16.mxu0 %v2391_v15  ;;  %2204 = vmatprep.subr.bf16.mxu1 %v2392_v16 }
 0x140   :  { %2183 = vmatpush3.bf16.msra.mxu0 %v2393_v56  ;;  %2205 = vmatpush3.bf16.msra.mxu1 %v2394_v19 }
 0x141   :  { %1353 = vmatprep.subr.bf16.mxu0 %v2397_v23  ;;  %1394 = vmatprep.subr.bf16.mxu1 %v2400_v25 }
 0x143   :  { %1022 = vmatmul.mubr.bf16.vlgmr.msra.gmra.mxu0 %v386_v21  ;;  %1062 = vmatmul.mubr.bf16.vlgmr.msra.gmra.mxu1 %v388_v20 }
 0x144   :  { %1385 = vmatprep.mubr.bf16.mxu0 %v2654_v0  ;;  %1426 = vmatprep.mubr.bf16.mxu1 %v2654_v0  ;;  %v2410_v0 = vld [vmem:[#allocation10 + $0xd0] ss:$20 sps:$4 sm:$0xff]  }
 0x145   :  { %1354 = vmatpush1.bf16.msra.mxu0 %v2395_v22  ;;  %1395 = vmatpush1.bf16.msra.mxu1 %v2398_v24  ;;  %v2443_v24 = vld [vmem:[#allocation10 + $0x128] ss:$20 sps:$4 sm:$0xff]  }
 0x146   :  { %1355 = vmatprep.subr.bf16.mxu0 %v2403_v26  ;;  %1396 = vmatprep.subr.bf16.mxu1 %v2406_v27  ;;  %v2452_v26 = vld [vmem:[#allocation11 + $0x38] sm:$0xff]   ;;  %v2455_v27 = vld [vmem:[#allocation11 + $0x70] sm:$0xff]  }
 0x149   :  { %1356 = vmatpush1.bf16.msra.mxu0 %v2401_v28  ;;  %1397 = vmatpush1.bf16.msra.mxu1 %v2404_v29  ;;  %v2444_v28 = vld [vmem:[#allocation10 + $0x100] ss:$20 sps:$4 sm:$0xff]  }
 0x14a   :  { %1357 = vmatprep.subr.bf16.mxu0 %v2409_v30  ;;  %1398 = vmatprep.subr.bf16.mxu1 %v2412_v31  ;;  %v2456_v29 = vld [vmem:[#allocation11 + $0x30] sm:$0xff]   ;;  %v2459_v30 = vld [vmem:[#allocation11 + $0x68] sm:$0xff]  }
 0x14b   :  { %v2445_v31 = vld [vmem:[#allocation10 + $0xd8] ss:$20 sps:$4 sm:$0xff]  }
 0x14d   :  { %1358 = vmatpush1.bf16.msra.mxu0 %v2407_v32  ;;  %1399 = vmatpush1.bf16.msra.mxu1 %v2410_v0  ;;  %v2460_v32 = vld [vmem:[#allocation11 + $0x28] sm:$0xff]   ;;  %v2463_v0 = vld [vmem:[#allocation11 + $0x60] sm:$0xff]  }
 0x14e   :  { %1359 = vmatprep.subr.bf16.mxu0 %v2415_v33  ;;  %1400 = vmatprep.subr.bf16.mxu1 %v2418_v34  ;;  %v2446_v33 = vld [vmem:[#allocation10 + $0xb0] ss:$20 sps:$4 sm:$0xff]  }
 0x14f   :  { %v2464_v34 = vld [vmem:[#allocation11 + $0x20] sm:$0xff]  }
 0x151   :  { %1360 = vmatpush1.bf16.msra.mxu0 %v2413_v35  ;;  %1401 = vmatpush1.bf16.msra.mxu1 %v2416_v36  ;;  %v2467_v35 = vld [vmem:[#allocation11 + $0x58] sm:$0xff]  }
 0x152   :  { %1361 = vmatprep.subr.bf16.mxu0 %v2421_v37  ;;  %1402 = vmatprep.subr.bf16.mxu1 %v2424_v38  ;;  %v2447_v36 = vld [vmem:[#allocation10 + $0x88] ss:$20 sps:$4 sm:$0xff]   ;;  %v2471_v38 = vld [vmem:[#allocation11 + $0x50] sm:$0xff]  }
 0x153   :  { %v2468_v37 = vld [vmem:[#allocation11 + $0x18] sm:$0xff]  }
 0x155   :  { %1362 = vmatpush1.bf16.msra.mxu0 %v2419_v39  ;;  %1403 = vmatpush1.bf16.msra.mxu1 %v2422_v40  ;;  %v2448_v39 = vld [vmem:[#allocation10 + $0x60] ss:$20 sps:$4 sm:$0xff]  }
 0x156   :  { %1363 = vmatprep.subr.bf16.mxu0 %v2427_v41  ;;  %1404 = vmatprep.subr.bf16.mxu1 %v2430_v42  ;;  %v2472_v40 = vld [vmem:[#allocation11 + $0x10] sm:$0xff]   ;;  %v2449_v41 = vld [vmem:[#allocation10 + $0x38] ss:$20 sps:$4 sm:$0xff]  }
 0x157   :  { %v2450_v42 = vld [vmem:[#allocation10 + $0x10] ss:$20 sps:$4 sm:$0xff]  }
 0x159   :  { %1364 = vmatpush1.bf16.msra.mxu0 %v2425_v43  ;;  %1405 = vmatpush1.bf16.msra.mxu1 %v2428_v44  ;;  %v2453_v43 = vld [vmem:[#allocation11 + $0xf8] sm:$0xff]  }
 0x15a   :  { %1365 = vmatprep.subr.bf16.mxu0 %v2433_v45  ;;  %1406 = vmatprep.subr.bf16.mxu1 %v2436_v47  ;;  %v2454_v44 = vld [vmem:[#allocation11 + $0xb8] sm:$0xff]   ;;  %v2457_v45 = vld [vmem:[#allocation11 + $0xf0] sm:$0xff]   ;;  %v2461_v47 = vld [vmem:[#allocation11 + $0xe8] sm:$0xff]  }
 0x15d   :  { %1366 = vmatpush1.bf16.msra.mxu0 %v2431_v46  ;;  %1407 = vmatpush1.bf16.msra.mxu1 %v2434_v48  ;;  %v2458_v46 = vld [vmem:[#allocation11 + $0xb0] sm:$0xff]   ;;  %v2462_v48 = vld [vmem:[#allocation11 + $0xa8] sm:$0xff]  }
 0x15e   :  { %1367 = vmatprep.subr.bf16.mxu0 %v2439_v49  ;;  %1408 = vmatprep.subr.bf16.mxu1 %v2442_v51  ;;  %v2465_v49 = vld [vmem:[#allocation11 + $0xe0] sm:$0xff]   ;;  %v2469_v51 = vld [vmem:[#allocation11 + $0xd8] sm:$0xff]  }
 0x161   :  { %1368 = vmatpush1.bf16.msra.mxu0 %v2437_v50  ;;  %1409 = vmatpush1.bf16.msra.mxu1 %v2440_v52  ;;  %v2466_v50 = vld [vmem:[#allocation11 + $0xa0] sm:$0xff]   ;;  %v2470_v52 = vld [vmem:[#allocation11 + $0x98] sm:$0xff]  }
 0x162   :  { %2274 = vmatprep.subr.bf16.mxu0 %v2655_v60  ;;  %2221 = vmatprep.subr.bf16.mxu1 %v2451_v61  ;;  %v2473_v61 = vld [vmem:[#allocation11 + $0xd0] sm:$0xff]  }
 0x1e3   :  { %v2140_v62 = vpop.f32.mrf.mxu0  ;;  %v2162_v63 = vpop.f32.mrf.mxu1 }
 0x1e5   :  { %v2141_v2 = vpop.f32.mrf.mxu0  ;;  %v2163_v3 = vpop.f32.mrf.mxu1 }
 0x1e6   :  { %v2142_v8 = vadd.f32 %v2141_v2, %v2140_v62  ;;  %v2164_v12 = vadd.f32 %v2163_v3, %v2162_v63  ;;  %v2474_v62 = vld [vmem:[#allocation11 + $0x90] sm:$0xff]   ;;  %v2475_v63 = vld [vmem:[#allocation11 + $0x48] sm:$0xff]  }
 0x1e7   :  { %v2143_v4 = vpop.f32.mrf.mxu0  ;;  %v2165_v5 = vpop.f32.mrf.mxu1  ;;  %v2476_v2 = vld [vmem:[#allocation11 + $0x8] sm:$0xff]  }
 0x1e8   :  { %v944_v10 = vadd.f32 %v2142_v8, %v1978_v9  ;;  %v2477_v3 = vld [vmem:[#allocation11 + $0xc8] sm:$0xff]   ;;  %v2479_v5 = vld [vmem:[#allocation11 + $0x40] sm:$0xff]   ;;  %v1118_v9 = vld [vmem:[%s2832_s6] sm:$0x1f] }
 0x1e9   :  { %v2144_v6 = vpop.f32.mrf.mxu0  ;;  %v2166_v7 = vpop.f32.mrf.mxu1  ;;  %v2478_v4 = vld [vmem:[#allocation11 + $0x88] sm:$0xff]   ;;  %v2482_v8 = vld [vmem:[#allocation11 + $0x80] sm:$0xff]  }
 0x1ea   :  { %v984_v15 = vadd.f32 %v2164_v12, %v944_v10  ;;  %v2480_v6 = vld [vmem:[#allocation11] sm:$0xff]   ;;  %v1123_v10 = vrot.slane %v1118_v9, %v128_v55  ;;  %v1127_v12 = vrot.slane %v1118_v9, %v132_v58 }
 0x1eb   :  { %v2481_v7 = vld [vmem:[#allocation11 + $0xc0] sm:$0xff]  }
 0x203   :  { %v2184_v11 = vpop.f32.mrf.mxu0  ;;  %v2206_v13 = vpop.f32.mrf.mxu1 }
 0x205   :  { %v2185_v14 = vpop.f32.mrf.mxu0  ;;  %v2207_v17 = vpop.f32.mrf.mxu1 }
 0x206   :  { %v2186_v16 = vadd.f32 %v2185_v14, %v2184_v11  ;;  %v2208_v19 = vadd.f32 %v2207_v17, %v2206_v13  ;;  %v1131_v11 = vrot.slane %v1118_v9, %v136_v57  ;;  %v1135_v13 = vrot.slane %v1118_v9, %v140_v59 }
 0x207   :  { %v2187_v56 = vpop.f32.mrf.mxu0  ;;  %v2209_v20 = vpop.f32.mrf.mxu1 }
 0x208   :  { %v1024_v18 = vadd.f32 %v2186_v16, %v984_v15 }
 0x209   :  { %v2188_v21 = vpop.f32.mrf.mxu0  ;;  %v2210_v23 = vpop.f32.mrf.mxu1 }
 0x20a   :  { %v1064_v22 = vadd.f32 %v2208_v19, %v1024_v18 }
 0x20c   :  { %v1069_v25 = vpack.c.bf16 %v1064_v22, %v1064_v22 }
 0x20e   :  { %1386 = vmatmul.mubr.bf16.vlgmr.msra.gmra.mxu0 %v1069_v25  ;;  %1427 = vmatmul.mubr.bf16.vlgmr.msra.gmra.mxu1 %v1069_v25 }
 0x20f   :  { %2275 = vmatpush3.bf16.msra.mxu0 %v2443_v24  ;;  %2290 = vmatprep.mubr.msk.bf16.mxu0 %vm2656_vm1, %v2655_v60 }
 0x210   :  { %2276 = vmatprep.subr.bf16.mxu0 %v2655_v60  ;;  %2222 = vmatpush3.bf16.msra.mxu1 %v2452_v26 }
 0x211   :  { %2223 = vmatprep.subr.bf16.mxu1 %v2455_v27 }
 0x213   :  { %2277 = vmatpush3.bf16.msra.mxu0 %v2444_v28  ;;  %v2483_v28 = vld [vmem:[#allocation11 + $0x138] sm:$0xff]  }
 0x214   :  { %2278 = vmatprep.subr.bf16.mxu0 %v2655_v60  ;;  %2224 = vmatpush3.bf16.msra.mxu1 %v2456_v29 }
 0x215   :  { %2225 = vmatprep.subr.bf16.mxu1 %v2459_v30  ;;  %v2484_v30 = vld [vmem:[#allocation11 + $0x130] sm:$0xff]  }
 0x217   :  { %2279 = vmatpush3.bf16.msra.mxu0 %v2445_v31  ;;  %v2485_v31 = vld [vmem:[#allocation11 + $0x128] sm:$0xff]  }
 0x218   :  { %2280 = vmatprep.subr.bf16.mxu0 %v2655_v60  ;;  %2226 = vmatpush3.bf16.msra.mxu1 %v2460_v32  ;;  %v2486_v32 = vld [vmem:[#allocation11 + $0x120] sm:$0xff]  }
 0x219   :  { %2227 = vmatprep.subr.bf16.mxu1 %v2463_v0  ;;  %v2487_v0 = vld [vmem:[#allocation11 + $0x118] sm:$0xff]  }
 0x21b   :  { %2281 = vmatpush3.bf16.msra.mxu0 %v2446_v33  ;;  %v2488_v33 = vld [vmem:[#allocation11 + $0x110] sm:$0xff]  }
 0x21c   :  { %2282 = vmatprep.subr.bf16.mxu0 %v2655_v60  ;;  %2228 = vmatpush3.bf16.msra.mxu1 %v2464_v34  ;;  %v1139_v34 = vrot.slane %v1118_v9, %v144_v1 }
 0x21d   :  { %2229 = vmatprep.subr.bf16.mxu1 %v2467_v35  ;;  %v2489_v35 = vld [vmem:[#allocation11 + $0x108] sm:$0xff]  }
 0x21f   :  { %2283 = vmatpush3.bf16.msra.mxu0 %v2447_v36 }
 0x220   :  { %2284 = vmatprep.subr.bf16.mxu0 %v2655_v60  ;;  %2230 = vmatpush3.bf16.msra.mxu1 %v2468_v37 }
 0x221   :  { %2231 = vmatprep.subr.bf16.mxu1 %v2471_v38 }
 0x223   :  { %2285 = vmatpush3.bf16.msra.mxu0 %v2448_v39  ;;  %v2490_v39 = vld [vmem:[#allocation11 + $0x100] sm:$0xff]  }
 0x224   :  { %2286 = vmatprep.subr.bf16.mxu0 %v2655_v60  ;;  %2232 = vmatpush3.bf16.msra.mxu1 %v2472_v40 }
 0x225   :  { %2233 = vmatprep.subr.bf16.mxu1 %v2475_v63 }
 0x227   :  { %2287 = vmatpush3.bf16.msra.mxu0 %v2449_v41 }
 0x228   :  { %2288 = vmatprep.subr.bf16.mxu0 %v2655_v60  ;;  %2234 = vmatpush3.bf16.msra.mxu1 %v2476_v2 }
 0x229   :  { %2235 = vmatprep.subr.bf16.mxu1 %v2479_v5 }
 0x22b   :  { %2289 = vmatpush3.bf16.msra.mxu0 %v2450_v42 }
 0x22c   :  { %2243 = vmatprep.subr.bf16.mxu0 %v2453_v43  ;;  %2236 = vmatpush3.bf16.msra.mxu1 %v2480_v6 }
 0x22d   :  { %2294 = vmatprep.subr.bf16.mxu1 %v2655_v60 }
 0x22e   :  { %2291 = vmatmul.mubr.bf16.vlgmr.msra.gmra.mxu0 %v1069_v25 }
 0x22f   :  { %2244 = vmatpush3.bf16.msra.mxu0 %v2454_v44 }
 0x230   :  { %2245 = vmatprep.subr.bf16.mxu0 %v2457_v45 }
 0x233   :  { %2246 = vmatpush3.bf16.msra.mxu0 %v2458_v46 }
 0x234   :  { %2247 = vmatprep.subr.bf16.mxu0 %v2461_v47 }
 0x237   :  { %2248 = vmatpush3.bf16.msra.mxu0 %v2462_v48 }
 0x238   :  { %2249 = vmatprep.subr.bf16.mxu0 %v2465_v49 }
 0x23b   :  { %2250 = vmatpush3.bf16.msra.mxu0 %v2466_v50 }
 0x23c   :  { %2251 = vmatprep.subr.bf16.mxu0 %v2469_v51  ;;  %v2083_v51 = vld [vmem:[%s2834_s8] ss:$0 sm:$0xff] }
 0x23f   :  { %2252 = vmatpush3.bf16.msra.mxu0 %v2470_v52 }
 0x240   :  { %2253 = vmatprep.subr.bf16.mxu0 %v2473_v61 }
 0x243   :  { %2254 = vmatpush3.bf16.msra.mxu0 %v2474_v62 }
 0x244   :  { %2255 = vmatprep.subr.bf16.mxu0 %v2477_v3 }
 0x247   :  { %2256 = vmatpush3.bf16.msra.mxu0 %v2478_v4 }
 0x248   :  { %2257 = vmatprep.subr.bf16.mxu0 %v2481_v7 }
 0x24b   :  { %2258 = vmatpush3.bf16.msra.mxu0 %v2482_v8 }
 0x2ce   :  { %v1387_v14 = vpop.f32.mrf.mxu0  ;;  %v1428_v15 = vpop.f32.mrf.mxu1 }
 0x2cf   :  { %v1388_v16 = vadd.f32 %v1387_v14, %v1123_v10  ;;  %v1429_v17 = vadd.f32 %v1428_v15, %v1131_v11 }
 0x2d0   :  { %v1389_v56 = vpop.f32.mrf.mxu0  ;;  %v1430_v18 = vpop.f32.mrf.mxu1 }
 0x2d1   :  { %v1390_v19 = vadd.f32 %v1389_v56, %v1127_v12  ;;  %v1431_v20 = vadd.f32 %v1430_v18, %v1135_v13  ;;  %v1475_v21 = vmax.f32 %v1388_v16, 0.0  ;;  %v1477_v22 = vmax.f32 %v1429_v17, 0.0 }
 0x2d2   :  { %v1391_v55 = vpop.f32.mrf.mxu0  ;;  %v1432_v23 = vpop.f32.mrf.mxu1 }
 0x2d3   :  { %v1476_v24 = vmax.f32 %v1390_v19, 0.0  ;;  %v1478_v57 = vmax.f32 %v1431_v20, 0.0  ;;  %v1480_v59 = vpack.c.bf16 %v1475_v21, %v1475_v21  ;;  %v1482_v29 = vpack.c.bf16 %v1477_v22, %v1477_v22 }
 0x2d4   :  { %v1392_v25 = vpop.f32.mrf.mxu0  ;;  %v1433_v26 = vpop.f32.mrf.mxu1 }
 0x2d5   :  { %v1481_v58 = vpack.c.bf16 %v1476_v24, %v1476_v24  ;;  %v1483_v27 = vpack.c.bf16 %v1478_v57, %v1478_v57 }
 0x2d7   :  { %1844 = vmatprep.mubr.bf16.mxu1 %v1481_v58  ;;  %1884 = vmatprep.mubr.bf16.mxu0 %v1483_v27 }
 0x2d8   :  { %1845 = vmatmul.mubr.bf16.vlgmr.msra.gmra.mxu1 %v1480_v59  ;;  %1885 = vmatmul.mubr.bf16.vlgmr.msra.gmra.mxu0 %v1482_v29 }
 0x2d9   :  { %2295 = vmatpush3.bf16.msra.mxu1 %v2483_v28  ;;  %2310 = vmatprep.mubr.msk.bf16.mxu1 %vm2656_vm1, %v2655_v60 }
 0x2da   :  { %2296 = vmatprep.subr.bf16.mxu1 %v2655_v60 }
 0x2dd   :  { %2297 = vmatpush3.bf16.msra.mxu1 %v2484_v30 }
 0x2de   :  { %2298 = vmatprep.subr.bf16.mxu1 %v2655_v60 }
 0x2e1   :  { %2299 = vmatpush3.bf16.msra.mxu1 %v2485_v31 }
 0x2e2   :  { %2300 = vmatprep.subr.bf16.mxu1 %v2655_v60 }
 0x2e5   :  { %2301 = vmatpush3.bf16.msra.mxu1 %v2486_v32 }
 0x2e6   :  { %2302 = vmatprep.subr.bf16.mxu1 %v2655_v60 }
 0x2e9   :  { %2303 = vmatpush3.bf16.msra.mxu1 %v2487_v0 }
 0x2ea   :  { %2304 = vmatprep.subr.bf16.mxu1 %v2655_v60 }
 0x2ed   :  { %2305 = vmatpush3.bf16.msra.mxu1 %v2488_v33 }
 0x2ee   :  { %v1469_v36 = vpop.f32.mrf.mxu0  ;;  %2306 = vmatprep.subr.bf16.mxu1 %v2655_v60 }
 0x2ef   :  { %v1470_v37 = vadd.f32 %v1469_v36, %v1139_v34 }
 0x2f0   :  { %v2292_v38 = vpop.f32.mrf.mxu0 }
 0x2f1   :  { %2307 = vmatpush3.bf16.msra.mxu1 %v2489_v35  ;;  %v1479_v40 = vmax.f32 %v1470_v37, 0.0 }
 0x2f2   :  { %v1472_v41 = vpop.f32.mrf.mxu0  ;;  %2308 = vmatprep.subr.bf16.mxu1 %v2655_v60  ;;  %v1933_v60 = vand.u32 127, %v126_v53 }
 0x2f3   :  { %v1484_v43 = vpack.c.bf16 %v1479_v40, %v1479_v40 }
 0x2f4   :  { %v2293_v42 = vpop.f32.mrf.mxu0  ;;  %vm1934_vm2 = vcmp.lt.s32.totalorder %v1933_v60, 6  ;;  %vm1939_vm3 = vcmp.eq.s32.totalorder %v1933_v60, 6 }
 0x2f5   :  { %2309 = vmatpush3.bf16.msra.mxu1 %v2490_v39 }
 0x2f8   :  { %2311 = vmatmul.mubr.bf16.vlgmr.msra.gmra.mxu1 %v1484_v43 }
 0x398   :  { %v2237_v44 = vpop.f32.mrf.mxu1  ;;  %v2259_v54 = vpop.f32.mrf.mxu0 }
 0x39a   :  { %v2238_v1 = vpop.f32.mrf.mxu1  ;;  %v2260_v45 = vpop.f32.mrf.mxu0 }
 0x39b   :  { %v2239_v50 = vadd.f32 %v2238_v1, %v2237_v44  ;;  %v2261_v61 = vadd.f32 %v2260_v45, %v2259_v54 }
 0x39c   :  { %v2240_v46 = vpop.f32.mrf.mxu1  ;;  %v2262_v47 = vpop.f32.mrf.mxu0 }
 0x39d   :  { %v1847_v52 = vadd.f32 %v2239_v50, %v2083_v51 }
 0x39e   :  { %v2241_v48 = vpop.f32.mrf.mxu1  ;;  %v2263_v49 = vpop.f32.mrf.mxu0 }
 0x39f   :  { %v1887_v62 = vadd.f32 %v2261_v61, %v1847_v52 }
 0x3b8   :  { %v1926_v63 = vpop.f32.mrf.mxu1 }
 0x3b9   :  { %v1927_v2 = vadd.f32 %v1926_v63, %v1887_v62 }
 0x3ba   :  { %v2312_v3 = vpop.f32.mrf.mxu1 }
 0x3bb   :  { %v1935_v4 = vsel %vm1934_vm2, %v1927_v2, 0.0  ;;  %v1940_v7 = vsel %vm1939_vm3, %v1927_v2, 0.0 }
 0x3bc   :  { %v1929_v5 = vpop.f32.mrf.mxu1  ;;  %1936 = vadd.xlane.f32.xlu0 %v1935_v4 }
 0x3be   :  { %v2313_v6 = vpop.f32.mrf.mxu1 }
 0x3c0   :  { %1941 = vadd.xlane.f32.xlu0 %v1940_v7 }
 0x445   :  { %v1937_v8 = vpop.xlane.xlu0 %1936 }
 0x446   :  { %v1938_v10 = vmul.f32 0.16666667, %v1937_v8 }
 0x449   :  { %v1942_v9 = vpop.xlane.xlu0 %1941 }
 0x44a   :  { %v1943_v11 = vadd.f32 %v1942_v9, %v1927_v2 }
 0x44c   :  { %v1944_v12 = vsub.f32 %v1943_v11, %v1938_v10 }
 0x44e   :  { %1945 = vst [vmem:[#allocation13] sm:$0xff] %v1944_v12 }
 0x44f   :  { %1950 = vsyncadd [#allocation4], 96  ;;  %s2657_s8 = smov [#allocation13]  }
 0x450   :  { %s1951_s24 = sshll.u32 %s2657_s8, 4  ;;  %s1952_s24 = int_to_ptr.vmem [resolvable:$true] %s1951_s24 }
 0x451   :  { %s2611_s25 = scalar_lea.vmem %s1952_s24, 32  ;;  %s2615_s26 = scalar_lea.vmem %s1952_s24, 128 }
 0x452   :  { %p2612_p2 = scmp.ne.s32.totalorder %s1952_s24, %s2611_s25  ;;  %p2616_p3 = scmp.lt.s32.totalorder %s1952_s24, %s1952_s24 }
 0x453   :  { %p2617_p4 = scmp.lt.s32.totalorder %s2615_s26, %s2611_s25 }
 0x455   :  { %p2618_p5 = por %p2617_p4, %p2616_p3 }
 0x457   :  { %p2619_p6 = pnand %p2618_p5, %p2612_p2 }
 0x459   :  { %2622 = shalt.err (!%p2619_p6)
}
 0x45a   :  { %1957 = dma.vmem_to_hbm [thread:$0]  %s1952_s24, 32, %s2835_s9, [#allocation4], %s2643_s13, %s2643_s13, %s2649_s28  }
 0x45b   :  { %2639 = dma.done.wait [#allocation4], 128  }
 0x45c   :  { %2640 = vsyncadd [#allocation4], 4294967168 }
 0x45d   :  { %1961 = vsyncpa [#allocation3], 1 }
 0x45e   :  { %1962 = vsyncpa [#allocation6], 1 }
 0x45f   :  { %1963 = vsyncpa [#allocation9], 1 }
 0x460   :  { %1964 = vsyncpa [#allocation12], 1 }
 0x461   :  { %1965 = vsyncpa [#allocation4], 1 }

</bundles_post_ra>
